<compile_context>
chip_gen: v5e
topology: v5e:2x2
jax: 0.10.0
libtpu: 0.0.40
codegen_flags: <defaults>
</compile_context>

<pallas_src>
import math

import numpy as np
import jax
import jax.numpy as jnp
from jax.experimental import pallas as pl
from jax.experimental.pallas import tpu as pltpu

EPS = 1e-5       # PyTorch BatchNorm1d default eps
LANES = 128      # TPU lane width — every channel dim padded to this
LOOKAHEAD = 2    # adjacency panel DMAs kept in flight ahead of compute


def _round_up(a, b):
    return (a + b - 1) // b * b


# ----------------------------------------------------------------------------
# Host-side glue: neighbourhood sampling (RankSAGE.neighbourhood_sampling)
# ----------------------------------------------------------------------------
def neighbourhood_sampling_np(edge_index: np.ndarray, top_neighbours: int) -> np.ndarray:
    """edge_index: int array (2, E). Keep, per source node, the edges to the
    `top_neighbours` highest in-degree destination nodes."""
    neighbors = {}
    for src, dst in edge_index.T.tolist():
        neighbors.setdefault(src, []).append(dst)
    num_nodes = int(edge_index.max()) + 1
    degrees = np.zeros(num_nodes, dtype=np.float64)
    np.add.at(degrees, edge_index[1], 1.0)
    sampled = []
    for node, nbrs in neighbors.items():
        nbr_deg = degrees[np.asarray(nbrs)]
        top_idx = np.argsort(nbr_deg)[-top_neighbours:]
        for i in top_idx:
            sampled.append((node, nbrs[i]))
    return np.asarray(sampled, dtype=np.int64).T


def build_count_adjacency(edge_index: np.ndarray, num_nodes: int):
    """Count adjacency (exact small ints) + f32 inverse in-degree per node.
    Edge (src, dst): message flows src -> dst, aggregated at dst.
    mean_{j in N(i)} x_j  ==  inv_deg[i] * (A_cnt @ X)[i]."""
    A = np.zeros((num_nodes, num_nodes), dtype=np.float32)
    src, dst = edge_index
    np.add.at(A, (dst, src), 1.0)                      # message counts
    deg = A.sum(axis=1)
    inv_deg = np.where(deg > 0.0, 1.0 / np.maximum(deg, 1.0), 0.0).astype(np.float32)
    return A, inv_deg


# ----------------------------------------------------------------------------
# Pallas kernel: fused RankSAGE forward
# ----------------------------------------------------------------------------
def make_ranksage_kernel(out_ch: int, n_real: int, n_pad: int, panel: int,
                         num_panels: int):
    P = panel

    def kernel(x_ref, a_hbm, invdeg_ref,
               w1l_ref, w1r_ref, w2l_ref, w2r_ref, wh_ref, wo_ref, vec_ref,
               out_ref,
               a_vmem, h1_ref, agg2_ref, dma_sems):
        vec = vec_ref[...]                       # (16, 128) f32 packed vectors
        b1, g1, be1 = vec[0:1], vec[1:2], vec[2:3]
        b2, g2, be2 = vec[3:4], vec[4:5], vec[5:6]
        bh, g3, be3 = vec[6:7], vec[7:8], vec[8:9]
        bo = vec[9:10]

        inv_n = 1.0 / float(n_real)
        # Row-validity mask over padded node rows: BatchNorm statistics are
        # taken exactly over the real N nodes.
        row_ids = jax.lax.broadcasted_iota(jnp.int32, (n_pad, 1), 0)
        mask = (row_ids < n_real).astype(jnp.float32)

        def batchnorm(h, gamma, beta):
            # Training-mode BatchNorm1d, biased variance, two-pass (mean, then
            # centered sum of squares).  axis-0 sums stay on the VPU/XLU; the
            # MXU is reserved for the aggregation / feature-transform matmuls.
            mean = jnp.sum(h * mask, axis=0, keepdims=True) * inv_n
            d = (h - mean) * mask
            var = jnp.sum(d * d, axis=0, keepdims=True) * inv_n
            return (h - mean) * jax.lax.rsqrt(var + EPS) * gamma + beta

        def a_panel_copy(idx):
            sl = pl.ds(idx * P, P)
            return pltpu.make_async_copy(a_hbm.at[sl, :], a_vmem.at[sl, :],
                                         dma_sems.at[idx])

        # Prime the adjacency panel stream (A lives in HBM; its DMA overlaps
        # the layer-1 compute below and lands A at its resident VMEM slab).
        for q in range(min(LOOKAHEAD, num_panels)):
            a_panel_copy(q).start()

        xv = x_ref[...]                          # (n_pad, 128) bf16
        w1l = w1l_ref[...]
        w1r = w1r_ref[...]

        # ---- SAGEConv 1, streamed over row panels of A --------------------
        def layer1_body(p, carry):
            a_panel_copy(p).wait()

            @pl.when(p + LOOKAHEAD < num_panels)
            def _():
                nxt = jnp.minimum(p + LOOKAHEAD, num_panels - 1)
                a_panel_copy(nxt).start()

            start = pl.multiple_of(p * P, 128)
            rows = pl.ds(start, P)
            agg = jnp.dot(a_vmem[rows, :], xv,
                          preferred_element_type=jnp.float32) * invdeg_ref[rows, :]
            h = (jnp.dot(agg.astype(jnp.bfloat16), w1l,
                         preferred_element_type=jnp.float32)
                 + jnp.dot(x_ref[rows, :], w1r,
                           preferred_element_type=jnp.float32)
                 + b1)
            h1_ref[rows, :] = h
            return carry

        jax.lax.fori_loop(0, num_panels, layer1_body, 0)

        h1 = jnp.maximum(batchnorm(h1_ref[...], g1, be1), 0.0)   # bn1 + relu
        h1b = h1.astype(jnp.bfloat16)

        # ---- SAGEConv 2 aggregation (A is now fully VMEM-resident) --------
        def layer2_body(p, carry):
            start = pl.multiple_of(p * P, 128)
            rows = pl.ds(start, P)
            agg2_ref[rows, :] = jnp.dot(a_vmem[rows, :], h1b,
                                        preferred_element_type=jnp.float32) \
                * invdeg_ref[rows, :]
            return carry

        jax.lax.fori_loop(0, num_panels, layer2_body, 0)

        h = (jnp.dot(agg2_ref[...].astype(jnp.bfloat16), w2l_ref[...],
                     preferred_element_type=jnp.float32)
             + jnp.dot(h1b, w2r_ref[...], preferred_element_type=jnp.float32)
             + b2)
        h = jnp.maximum(batchnorm(h, g2, be2), 0.0)               # bn2 + relu

        # ---- hidden_fc -> relu -> bn3 (matches module order) --------------
        h = jnp.dot(h.astype(jnp.bfloat16), wh_ref[...],
                    preferred_element_type=jnp.float32) + bh
        h = jnp.maximum(h, 0.0)
        h = batchnorm(h, g3, be3)

        # ---- fc -> log_softmax over the REAL out_ch lanes ------------------
        logits = jnp.dot(h.astype(jnp.bfloat16), wo_ref[...],
                         preferred_element_type=jnp.float32) + bo
        col = jax.lax.broadcasted_iota(jnp.int32, logits.shape, 1)
        logits = jnp.where(col < out_ch, logits, -1e30)
        m = jnp.max(logits, axis=1, keepdims=True)
        z = logits - m
        lse = jnp.log(jnp.sum(jnp.exp(z), axis=1, keepdims=True))
        out_ref[...] = z - lse                                     # lane-dense

    return kernel


# ----------------------------------------------------------------------------
# Wrapper: generation-gated sizing, padding, weight packing
# ----------------------------------------------------------------------------
def _tpu_vmem_capacity_bytes():
    cap = 64 * 1024 * 1024          # conservative fallback (v7x-sized)
    try:
        info = pltpu.get_tpu_info()
        cap = int(getattr(info, "vmem_capacity_bytes", cap))
    except Exception:
        pass
    return cap


def _panel_plan(n, vmem_cap_bytes):
    """Lane-dense node padding + generation-gated A row-panel size."""
    n128 = _round_up(max(n, 1), LANES)
    target = 256 if vmem_cap_bytes <= 64 * 1024 * 1024 else 512
    num_panels = max(1, math.ceil(n128 / target))
    panel = _round_up(math.ceil(n128 / num_panels), LANES)
    return num_panels * panel, panel, num_panels


def _pad_w(w):
    return jnp.pad(w, ((0, LANES - w.shape[0]), (0, LANES - w.shape[1])))


def pack_params(params):
    w1l = _pad_w(params["w1l"]).astype(jnp.bfloat16)
    w1r = _pad_w(params["w1r"]).astype(jnp.bfloat16)
    w2l = _pad_w(params["w2l"]).astype(jnp.bfloat16)
    w2r = _pad_w(params["w2r"]).astype(jnp.bfloat16)
    wh = _pad_w(params["wh"]).astype(jnp.bfloat16)
    wo = _pad_w(params["wo"]).astype(jnp.bfloat16)
    # Pack the ten (1, C) bias/gamma/beta vectors into ONE (16, 128) f32 array
    # (padding = 0, so padded channels stay exactly zero through BN / bias).
    vec = jnp.zeros((16, LANES), jnp.float32)
    for name, r in (("b1", 0), ("g1", 1), ("be1", 2),
                    ("b2", 3), ("g2", 4), ("be2", 5),
                    ("bh", 6), ("g3", 7), ("be3", 8),
                    ("bo", 9)):
        v = params[name].reshape(-1)
        vec = vec.at[r, : v.shape[0]].set(v)
    return w1l, w1r, w2l, w2r, wh, wo, vec


def ranksage_forward(x, A_counts, inv_deg, params):
    N, in_ch = x.shape
    out_ch = params["wo"].shape[1]

    cap = _tpu_vmem_capacity_bytes()
    n_pad, panel, num_panels = _panel_plan(N, cap)

    xp = jnp.zeros((n_pad, LANES), jnp.bfloat16).at[:N, :in_ch].set(
        x.astype(jnp.bfloat16))
    Ap = jnp.zeros((n_pad, n_pad), jnp.bfloat16).at[:N, :N].set(
        A_counts.astype(jnp.bfloat16))                 # counts are exact in bf16
    dp = jnp.zeros((n_pad, 1), jnp.float32).at[:N, 0].set(inv_deg)

    w1l, w1r, w2l, w2r, wh, wo, vec = pack_params(params)

    vmem = pl.BlockSpec(memory_space=pltpu.MemorySpace.VMEM)
    kernel = make_ranksage_kernel(out_ch, N, n_pad, panel, num_panels)

    out_p = pl.pallas_call(
        kernel,
        out_shape=jax.ShapeDtypeStruct((n_pad, LANES), jnp.float32),
        in_specs=[vmem,                                 # x (padded, bf16)
                  pl.BlockSpec(memory_space=pl.ANY),    # A stays in HBM, streamed
                  vmem,                                 # inv_deg (f32)
                  vmem, vmem, vmem, vmem, vmem, vmem,   # weight blocks (bf16)
                  vmem],                                # packed bias/gamma/beta
        out_specs=vmem,
        scratch_shapes=[
            pltpu.VMEM((n_pad, n_pad), jnp.bfloat16),   # resident A slab
            pltpu.VMEM((n_pad, LANES), jnp.float32),    # h1 (pre-BN)
            pltpu.VMEM((n_pad, LANES), jnp.float32),    # layer-2 aggregation
            pltpu.SemaphoreType.DMA((num_panels,)),     # one sem per A panel
        ],
        # ~85% of physical VMEM: ~54 MiB on v7x (64 MiB), ~108 MiB on v5e/v6e
        # (128 MiB).  Headroom covers the f32 output/intermediates and Mosaic
        # internal scratch.
        compiler_params=pltpu.CompilerParams(vmem_limit_bytes=int(cap * 0.85)),
    )(xp, Ap, dp, w1l, w1r, w2l, w2r, wh, wo, vec)
    return out_p[:N, :out_ch]


# ----------------------------------------------------------------------------
# Deterministic parameter construction
# ----------------------------------------------------------------------------
def init_params(key, in_ch, h1, h2, h_out, out_ch):
    ks = jax.random.split(key, 8)
    scale = 0.1
    return {
        # SAGEConv1: lin_l (aggregated path, has bias), lin_r (root, no bias)
        "w1l": scale * jax.random.normal(ks[0], (in_ch, h1), jnp.float32),
        "w1r": scale * jax.random.normal(ks[1], (in_ch, h1), jnp.float32),
        "b1": jnp.zeros((1, h1), jnp.float32),
        "g1": jnp.ones((1, h1), jnp.float32),
        "be1": jnp.zeros((1, h1), jnp.float32),
        # SAGEConv2
        "w2l": scale * jax.random.normal(ks[2], (h1, h2), jnp.float32),
        "w2r": scale * jax.random.normal(ks[3], (h1, h2), jnp.float32),
        "b2": jnp.zeros((1, h2), jnp.float32),
        "g2": jnp.ones((1, h2), jnp.float32),
        "be2": jnp.zeros((1, h2), jnp.float32),
        # hidden_fc + bn3
        "wh": scale * jax.random.normal(ks[4], (h2, h_out), jnp.float32),
        "bh": scale * jax.random.normal(ks[5], (1, h_out), jnp.float32),
        "g3": jnp.ones((1, h_out), jnp.float32),
        "be3": jnp.zeros((1, h_out), jnp.float32),
        # fc
        "wo": scale * jax.random.normal(ks[6], (h_out, out_ch), jnp.float32),
        "bo": scale * jax.random.normal(ks[7], (1, out_ch), jnp.float32),
    }


if __name__ == "__main__":
    # Small, deterministic problem setup
    N = 16            # nodes ("batch" for BatchNorm1d)
    E = 48            # edges before sampling
    in_ch, h1, h2, h_out, out_ch = 16, 32, 32, 32, 8
    top_neighbours = 3

    key = jax.random.PRNGKey(0)
    kx, ke_src, ke_dst = jax.random.split(key, 3)

    x = jax.random.normal(kx, (N, in_ch), jnp.float32)

    # Random directed edge list (2, E)
    src = np.asarray(jax.random.randint(ke_src, (E,), 0, N))
    dst = np.asarray(jax.random.randint(ke_dst, (E,), 0, N))
    keep = src != dst
    edge_index = np.stack([src[keep], dst[keep]]).astype(np.int64)

    # Host-side graph preprocessing (RankSAGE.neighbourhood_sampling semantics)
    sampled_edges = neighbourhood_sampling_np(edge_index, top_neighbours)
    A_counts_np, inv_deg_np = build_count_adjacency(sampled_edges, N)
    A_counts = jnp.asarray(A_counts_np)
    inv_deg = jnp.asarray(inv_deg_np)

    # aggregator_class == 'mean' (PyG SAGEConv default aggregation)
    params = init_params(jax.random.PRNGKey(0), in_ch, h1, h2, h_out, out_ch)

    out = ranksage_forward(x, A_counts, inv_deg, params)
    out = jax.block_until_ready(out)

    assert out.shape == (N, out_ch)
    # log-softmax rows must sum to 1 in prob space (normalization is f32)
    assert np.allclose(np.exp(np.asarray(out)).sum(axis=1), 1.0, atol=1e-3)
    assert np.all(np.isfinite(np.asarray(out)))
    print("KERNEL_OK")
</pallas_src>

<mosaic_0001>
module attributes {stable_mosaic.version = 11 : i64} {
  func.func @kernel(%arg0: memref<128x128xbf16, #tpu.memory_space<vmem>>, %arg1: memref<128x128xbf16, #tpu.memory_space<any>>, %arg2: memref<128x1xf32, #tpu.memory_space<vmem>>, %arg3: memref<128x128xbf16, #tpu.memory_space<vmem>>, %arg4: memref<128x128xbf16, #tpu.memory_space<vmem>>, %arg5: memref<128x128xbf16, #tpu.memory_space<vmem>>, %arg6: memref<128x128xbf16, #tpu.memory_space<vmem>>, %arg7: memref<128x128xbf16, #tpu.memory_space<vmem>>, %arg8: memref<128x128xbf16, #tpu.memory_space<vmem>>, %arg9: memref<16x128xf32, #tpu.memory_space<vmem>>, %arg10: memref<128x128xf32, #tpu.memory_space<vmem>>, %arg11: memref<128x128xbf16, #tpu.memory_space<vmem>>, %arg12: memref<128x128xf32, #tpu.memory_space<vmem>>, %arg13: memref<128x128xf32, #tpu.memory_space<vmem>>, %arg14: memref<1x!tpu.dma_semaphore, #tpu.memory_space<semaphore_mem>>) attributes {dimension_semantics = [], scalar_prefetch = 0 : i64, scratch_operands = 4 : i64, tpu.core_type = #tpu.core_type<tc>} {
    %c0 = arith.constant 0 : index
    %c0_0 = arith.constant 0 : index
    %0 = vector.load %arg9[%c0, %c0_0] : memref<16x128xf32, #tpu.memory_space<vmem>>, vector<16x128xf32>
    %1 = vector.extract_strided_slice %0 {offsets = [0, 0], sizes = [1, 128], strides = [1, 1]} : vector<16x128xf32> to vector<1x128xf32>
    %2 = vector.extract_strided_slice %0 {offsets = [1, 0], sizes = [1, 128], strides = [1, 1]} : vector<16x128xf32> to vector<1x128xf32>
    %3 = vector.extract_strided_slice %0 {offsets = [2, 0], sizes = [1, 128], strides = [1, 1]} : vector<16x128xf32> to vector<1x128xf32>
    %4 = vector.extract_strided_slice %0 {offsets = [3, 0], sizes = [1, 128], strides = [1, 1]} : vector<16x128xf32> to vector<1x128xf32>
    %5 = vector.extract_strided_slice %0 {offsets = [4, 0], sizes = [1, 128], strides = [1, 1]} : vector<16x128xf32> to vector<1x128xf32>
    %6 = vector.extract_strided_slice %0 {offsets = [5, 0], sizes = [1, 128], strides = [1, 1]} : vector<16x128xf32> to vector<1x128xf32>
    %7 = vector.extract_strided_slice %0 {offsets = [6, 0], sizes = [1, 128], strides = [1, 1]} : vector<16x128xf32> to vector<1x128xf32>
    %8 = vector.extract_strided_slice %0 {offsets = [7, 0], sizes = [1, 128], strides = [1, 1]} : vector<16x128xf32> to vector<1x128xf32>
    %9 = vector.extract_strided_slice %0 {offsets = [8, 0], sizes = [1, 128], strides = [1, 1]} : vector<16x128xf32> to vector<1x128xf32>
    %10 = vector.extract_strided_slice %0 {offsets = [9, 0], sizes = [1, 128], strides = [1, 1]} : vector<16x128xf32> to vector<1x128xf32>
    %11 = tpu.iota {dimensions = array<i32: 0>} : vector<128x1xi32>
    %c16_i32 = arith.constant 16 : i32
    %12 = vector.broadcast %c16_i32 : i32 to vector<128x1xi32>
    %13 = arith.cmpi slt, %11, %12 : vector<128x1xi32>
    %14 = arith.extui %13 : vector<128x1xi1> to vector<128x1xi32>
    %15 = arith.sitofp %14 : vector<128x1xi32> to vector<128x1xf32>
    %c0_i32 = arith.constant 0 : i32
    %c0_i32_1 = arith.constant 0 : i32
    %c0_i32_2 = arith.constant 0 : i32
    %16 = tpu.memref_slice %arg1[%c0_i32_1, %c0_i32_2] : memref<128x128xbf16, #tpu.memory_space<any>> -> memref<128x128xbf16, #tpu.memory_space<any>>
    %c0_i32_3 = arith.constant 0 : i32
    %c0_i32_4 = arith.constant 0 : i32
    %17 = tpu.memref_slice %arg11[%c0_i32_3, %c0_i32_4] : memref<128x128xbf16, #tpu.memory_space<vmem>> -> memref<128x128xbf16, #tpu.memory_space<vmem>>
    %18 = tpu.memref_slice %arg14[%c0_i32] : memref<1x!tpu.dma_semaphore, #tpu.memory_space<semaphore_mem>> -> memref<1x!tpu.dma_semaphore, #tpu.memory_space<semaphore_mem>>
    %19 = tpu.memref_squeeze %18 : memref<1x!tpu.dma_semaphore, #tpu.memory_space<semaphore_mem>> -> memref<!tpu.dma_semaphore, #tpu.memory_space<semaphore_mem>>
    tpu.enqueue_dma source(%16 : memref<128x128xbf16, #tpu.memory_space<any>>) target(%17 : memref<128x128xbf16, #tpu.memory_space<vmem>>) target_semaphore(%19 : memref<!tpu.dma_semaphore, #tpu.memory_space<semaphore_mem>>)
    %c0_5 = arith.constant 0 : index
    %c0_6 = arith.constant 0 : index
    %20 = vector.load %arg0[%c0_5, %c0_6] : memref<128x128xbf16, #tpu.memory_space<vmem>>, vector<128x128xbf16>
    %c0_7 = arith.constant 0 : index
    %c0_8 = arith.constant 0 : index
    %21 = vector.load %arg3[%c0_7, %c0_8] : memref<128x128xbf16, #tpu.memory_space<vmem>>, vector<128x128xbf16>
    %c0_9 = arith.constant 0 : index
    %c0_10 = arith.constant 0 : index
    %22 = vector.load %arg4[%c0_9, %c0_10] : memref<128x128xbf16, #tpu.memory_space<vmem>>, vector<128x128xbf16>
    %c0_i32_11 = arith.constant 0 : i32
    %c128_i32 = arith.constant 128 : i32
    %23 = arith.muli %c0_i32_11, %c128_i32 : i32
    %c0_i32_12 = arith.constant 0 : i32
    %24 = tpu.memref_slice %arg1[%23, %c0_i32_12] : memref<128x128xbf16, #tpu.memory_space<any>> -> memref<128x128xbf16, #tpu.memory_space<any>>
    %c0_i32_13 = arith.constant 0 : i32
    %25 = tpu.memref_slice %arg11[%23, %c0_i32_13] : memref<128x128xbf16, #tpu.memory_space<vmem>> -> memref<128x128xbf16, #tpu.memory_space<vmem>>
    %26 = tpu.memref_slice %arg14[%c0_i32_11] : memref<1x!tpu.dma_semaphore, #tpu.memory_space<semaphore_mem>> -> memref<1x!tpu.dma_semaphore, #tpu.memory_space<semaphore_mem>>
    %27 = tpu.memref_squeeze %26 : memref<1x!tpu.dma_semaphore, #tpu.memory_space<semaphore_mem>> -> memref<!tpu.dma_semaphore, #tpu.memory_space<semaphore_mem>>
    tpu.wait_dma2 semaphore(%27 : memref<!tpu.dma_semaphore, #tpu.memory_space<semaphore_mem>>) src(%24 : memref<128x128xbf16, #tpu.memory_space<any>>) dst(%25 : memref<128x128xbf16, #tpu.memory_space<vmem>>)
    %c2_i32 = arith.constant 2 : i32
    %28 = arith.addi %c0_i32_11, %c2_i32 : i32
    %c1_i32 = arith.constant 1 : i32
    %29 = arith.cmpi slt, %28, %c1_i32 : i32
    %30 = arith.extui %29 : i1 to i32
    %c0_i32_14 = arith.constant 0 : i32
    %31 = arith.cmpi ne, %30, %c0_i32_14 : i32
    scf.if %31 {
      %c2_i32_69 = arith.constant 2 : i32
      %183 = arith.addi %c0_i32_11, %c2_i32_69 : i32
      %c0_i32_70 = arith.constant 0 : i32
      %184 = arith.minsi %183, %c0_i32_70 : i32
      %c128_i32_71 = arith.constant 128 : i32
      %185 = arith.muli %184, %c128_i32_71 : i32
      %c0_i32_72 = arith.constant 0 : i32
      %186 = tpu.memref_slice %arg1[%185, %c0_i32_72] : memref<128x128xbf16, #tpu.memory_space<any>> -> memref<128x128xbf16, #tpu.memory_space<any>>
      %c0_i32_73 = arith.constant 0 : i32
      %187 = tpu.memref_slice %arg11[%185, %c0_i32_73] : memref<128x128xbf16, #tpu.memory_space<vmem>> -> memref<128x128xbf16, #tpu.memory_space<vmem>>
      %188 = tpu.memref_slice %arg14[%184] : memref<1x!tpu.dma_semaphore, #tpu.memory_space<semaphore_mem>> -> memref<1x!tpu.dma_semaphore, #tpu.memory_space<semaphore_mem>>
      %189 = tpu.memref_squeeze %188 : memref<1x!tpu.dma_semaphore, #tpu.memory_space<semaphore_mem>> -> memref<!tpu.dma_semaphore, #tpu.memory_space<semaphore_mem>>
      tpu.enqueue_dma source(%186 : memref<128x128xbf16, #tpu.memory_space<any>>) target(%187 : memref<128x128xbf16, #tpu.memory_space<vmem>>) target_semaphore(%189 : memref<!tpu.dma_semaphore, #tpu.memory_space<semaphore_mem>>)
    } else {
    }
    %c128_i32_15 = arith.constant 128 : i32
    %32 = arith.muli %c0_i32_11, %c128_i32_15 : i32
    %33 = tpu.assume_multiple %32, 128 : i32
    %34 = arith.index_cast %33 : i32 to index
    %c0_16 = arith.constant 0 : index
    %35 = vector.load %arg11[%34, %c0_16] : memref<128x128xbf16, #tpu.memory_space<vmem>>, vector<128x128xbf16>
    %cst = arith.constant dense<0.000000e+00> : vector<128x128xf32>
    %36 = tpu.matmul %35, %20, %cst {dimension_numbers = #tpu.dot_dimension_numbers<[1], [0], [0], [1], [0, 0, 1, 1], [], []>} : vector<128x128xbf16>, vector<128x128xbf16>, vector<128x128xf32> -> vector<128x128xf32>
    %37 = arith.index_cast %33 : i32 to index
    %c0_17 = arith.constant 0 : index
    %38 = vector.load %arg2[%37, %c0_17] : memref<128x1xf32, #tpu.memory_space<vmem>>, vector<128x1xf32>
    %39 = vector.broadcast %38 : vector<128x1xf32> to vector<128x128xf32>
    %40 = arith.mulf %36, %39 : vector<128x128xf32>
    %41 = arith.truncf %40 : vector<128x128xf32> to vector<128x128xbf16>
    %cst_18 = arith.constant dense<0.000000e+00> : vector<128x128xf32>
    %42 = tpu.matmul %41, %21, %cst_18 {dimension_numbers = #tpu.dot_dimension_numbers<[1], [0], [0], [1], [0, 0, 1, 1], [], []>} : vector<128x128xbf16>, vector<128x128xbf16>, vector<128x128xf32> -> vector<128x128xf32>
    %43 = arith.index_cast %33 : i32 to index
    %c0_19 = arith.constant 0 : index
    %44 = vector.load %arg0[%43, %c0_19] : memref<128x128xbf16, #tpu.memory_space<vmem>>, vector<128x128xbf16>
    %cst_20 = arith.constant dense<0.000000e+00> : vector<128x128xf32>
    %45 = tpu.matmul %44, %22, %cst_20 {dimension_numbers = #tpu.dot_dimension_numbers<[1], [0], [0], [1], [0, 0, 1, 1], [], []>} : vector<128x128xbf16>, vector<128x128xbf16>, vector<128x128xf32> -> vector<128x128xf32>
    %46 = arith.addf %42, %45 : vector<128x128xf32>
    %47 = vector.broadcast %1 : vector<1x128xf32> to vector<128x128xf32>
    %48 = arith.addf %46, %47 : vector<128x128xf32>
    %49 = arith.index_cast %33 : i32 to index
    %c0_21 = arith.constant 0 : index
    %50 = vector.load %arg12[%49, %c0_21] : memref<128x128xf32, #tpu.memory_space<vmem>>, vector<128x128xf32>
    tpu.vector_store %arg12[%49, %c0_21], %48 {strides = array<i32>} : memref<128x128xf32, #tpu.memory_space<vmem>>, vector<128x128xf32>,
    %c1_i32_22 = arith.constant 1 : i32
    %c0_23 = arith.constant 0 : index
    %c0_24 = arith.constant 0 : index
    %51 = vector.load %arg12[%c0_23, %c0_24] : memref<128x128xf32, #tpu.memory_space<vmem>>, vector<128x128xf32>
    %52 = vector.broadcast %15 : vector<128x1xf32> to vector<128x128xf32>
    %53 = arith.mulf %51, %52 : vector<128x128xf32>
    %cst_25 = arith.constant dense<0.000000e+00> : vector<128xf32>
    %54 = vector.multi_reduction <add>, %53, %cst_25 [0] : vector<128x128xf32> to vector<128xf32>
    %55 = vector.shape_cast %54 : vector<128xf32> to vector<1x128xf32>
    %cst_26 = arith.constant 6.250000e-02 : f32
    %56 = vector.broadcast %cst_26 : f32 to vector<1x128xf32>
    %57 = arith.mulf %55, %56 : vector<1x128xf32>
    %58 = vector.broadcast %57 : vector<1x128xf32> to vector<128x128xf32>
    %59 = arith.subf %51, %58 : vector<128x128xf32>
    %60 = vector.broadcast %15 : vector<128x1xf32> to vector<128x128xf32>
    %61 = arith.mulf %59, %60 : vector<128x128xf32>
    %62 = arith.mulf %61, %61 : vector<128x128xf32>
    %cst_27 = arith.constant dense<0.000000e+00> : vector<128xf32>
    %63 = vector.multi_reduction <add>, %62, %cst_27 [0] : vector<128x128xf32> to vector<128xf32>
    %64 = vector.shape_cast %63 : vector<128xf32> to vector<1x128xf32>
    %cst_28 = arith.constant 6.250000e-02 : f32
    %65 = vector.broadcast %cst_28 : f32 to vector<1x128xf32>
    %66 = arith.mulf %64, %65 : vector<1x128xf32>
    %67 = vector.broadcast %57 : vector<1x128xf32> to vector<128x128xf32>
    %68 = arith.subf %51, %67 : vector<128x128xf32>
    %cst_29 = arith.constant 9.99999974E-6 : f32
    %69 = vector.broadcast %cst_29 : f32 to vector<1x128xf32>
    %70 = arith.addf %66, %69 : vector<1x128xf32>
    %71 = math.rsqrt %70 : vector<1x128xf32>
    %72 = vector.broadcast %71 : vector<1x128xf32> to vector<128x128xf32>
    %73 = arith.mulf %68, %72 : vector<128x128xf32>
    %74 = vector.broadcast %2 : vector<1x128xf32> to vector<128x128xf32>
    %75 = arith.mulf %73, %74 : vector<128x128xf32>
    %76 = vector.broadcast %3 : vector<1x128xf32> to vector<128x128xf32>
    %77 = arith.addf %75, %76 : vector<128x128xf32>
    %cst_30 = arith.constant 0.000000e+00 : f32
    %78 = vector.broadcast %cst_30 : f32 to vector<128x128xf32>
    %79 = arith.maximumf %77, %78 : vector<128x128xf32>
    %80 = arith.truncf %79 : vector<128x128xf32> to vector<128x128xbf16>
    %c0_i32_31 = arith.constant 0 : i32
    %c128_i32_32 = arith.constant 128 : i32
    %81 = arith.muli %c0_i32_31, %c128_i32_32 : i32
    %82 = tpu.assume_multiple %81, 128 : i32
    %83 = arith.index_cast %82 : i32 to index
    %c0_33 = arith.constant 0 : index
    %84 = vector.load %arg11[%83, %c0_33] : memref<128x128xbf16, #tpu.memory_space<vmem>>, vector<128x128xbf16>
    %cst_34 = arith.constant dense<0.000000e+00> : vector<128x128xf32>
    %85 = tpu.matmul %84, %80, %cst_34 {dimension_numbers = #tpu.dot_dimension_numbers<[1], [0], [0], [1], [0, 0, 1, 1], [], []>} : vector<128x128xbf16>, vector<128x128xbf16>, vector<128x128xf32> -> vector<128x128xf32>
    %86 = arith.index_cast %82 : i32 to index
    %c0_35 = arith.constant 0 : index
    %87 = vector.load %arg2[%86, %c0_35] : memref<128x1xf32, #tpu.memory_space<vmem>>, vector<128x1xf32>
    %88 = vector.broadcast %87 : vector<128x1xf32> to vector<128x128xf32>
    %89 = arith.mulf %85, %88 : vector<128x128xf32>
    %90 = arith.index_cast %82 : i32 to index
    %c0_36 = arith.constant 0 : index
    %91 = vector.load %arg13[%90, %c0_36] : memref<128x128xf32, #tpu.memory_space<vmem>>, vector<128x128xf32>
    tpu.vector_store %arg13[%90, %c0_36], %89 {strides = array<i32>} : memref<128x128xf32, #tpu.memory_space<vmem>>, vector<128x128xf32>,
    %c1_i32_37 = arith.constant 1 : i32
    %c0_38 = arith.constant 0 : index
    %c0_39 = arith.constant 0 : index
    %92 = vector.load %arg13[%c0_38, %c0_39] : memref<128x128xf32, #tpu.memory_space<vmem>>, vector<128x128xf32>
    %93 = arith.truncf %92 : vector<128x128xf32> to vector<128x128xbf16>
    %c0_40 = arith.constant 0 : index
    %c0_41 = arith.constant 0 : index
    %94 = vector.load %arg5[%c0_40, %c0_41] : memref<128x128xbf16, #tpu.memory_space<vmem>>, vector<128x128xbf16>
    %cst_42 = arith.constant dense<0.000000e+00> : vector<128x128xf32>
    %95 = tpu.matmul %93, %94, %cst_42 {dimension_numbers = #tpu.dot_dimension_numbers<[1], [0], [0], [1], [0, 0, 1, 1], [], []>} : vector<128x128xbf16>, vector<128x128xbf16>, vector<128x128xf32> -> vector<128x128xf32>
    %c0_43 = arith.constant 0 : index
    %c0_44 = arith.constant 0 : index
    %96 = vector.load %arg6[%c0_43, %c0_44] : memref<128x128xbf16, #tpu.memory_space<vmem>>, vector<128x128xbf16>
    %cst_45 = arith.constant dense<0.000000e+00> : vector<128x128xf32>
    %97 = tpu.matmul %80, %96, %cst_45 {dimension_numbers = #tpu.dot_dimension_numbers<[1], [0], [0], [1], [0, 0, 1, 1], [], []>} : vector<128x128xbf16>, vector<128x128xbf16>, vector<128x128xf32> -> vector<128x128xf32>
    %98 = arith.addf %95, %97 : vector<128x128xf32>
    %99 = vector.broadcast %4 : vector<1x128xf32> to vector<128x128xf32>
    %100 = arith.addf %98, %99 : vector<128x128xf32>
    %101 = vector.broadcast %15 : vector<128x1xf32> to vector<128x128xf32>
    %102 = arith.mulf %100, %101 : vector<128x128xf32>
    %cst_46 = arith.constant dense<0.000000e+00> : vector<128xf32>
    %103 = vector.multi_reduction <add>, %102, %cst_46 [0] : vector<128x128xf32> to vector<128xf32>
    %104 = vector.shape_cast %103 : vector<128xf32> to vector<1x128xf32>
    %cst_47 = arith.constant 6.250000e-02 : f32
    %105 = vector.broadcast %cst_47 : f32 to vector<1x128xf32>
    %106 = arith.mulf %104, %105 : vector<1x128xf32>
    %107 = vector.broadcast %106 : vector<1x128xf32> to vector<128x128xf32>
    %108 = arith.subf %100, %107 : vector<128x128xf32>
    %109 = vector.broadcast %15 : vector<128x1xf32> to vector<128x128xf32>
    %110 = arith.mulf %108, %109 : vector<128x128xf32>
    %111 = arith.mulf %110, %110 : vector<128x128xf32>
    %cst_48 = arith.constant dense<0.000000e+00> : vector<128xf32>
    %112 = vector.multi_reduction <add>, %111, %cst_48 [0] : vector<128x128xf32> to vector<128xf32>
    %113 = vector.shape_cast %112 : vector<128xf32> to vector<1x128xf32>
    %cst_49 = arith.constant 6.250000e-02 : f32
    %114 = vector.broadcast %cst_49 : f32 to vector<1x128xf32>
    %115 = arith.mulf %113, %114 : vector<1x128xf32>
    %116 = vector.broadcast %106 : vector<1x128xf32> to vector<128x128xf32>
    %117 = arith.subf %100, %116 : vector<128x128xf32>
    %cst_50 = arith.constant 9.99999974E-6 : f32
    %118 = vector.broadcast %cst_50 : f32 to vector<1x128xf32>
    %119 = arith.addf %115, %118 : vector<1x128xf32>
    %120 = math.rsqrt %119 : vector<1x128xf32>
    %121 = vector.broadcast %120 : vector<1x128xf32> to vector<128x128xf32>
    %122 = arith.mulf %117, %121 : vector<128x128xf32>
    %123 = vector.broadcast %5 : vector<1x128xf32> to vector<128x128xf32>
    %124 = arith.mulf %122, %123 : vector<128x128xf32>
    %125 = vector.broadcast %6 : vector<1x128xf32> to vector<128x128xf32>
    %126 = arith.addf %124, %125 : vector<128x128xf32>
    %cst_51 = arith.constant 0.000000e+00 : f32
    %127 = vector.broadcast %cst_51 : f32 to vector<128x128xf32>
    %128 = arith.maximumf %126, %127 : vector<128x128xf32>
    %129 = arith.truncf %128 : vector<128x128xf32> to vector<128x128xbf16>
    %c0_52 = arith.constant 0 : index
    %c0_53 = arith.constant 0 : index
    %130 = vector.load %arg7[%c0_52, %c0_53] : memref<128x128xbf16, #tpu.memory_space<vmem>>, vector<128x128xbf16>
    %cst_54 = arith.constant dense<0.000000e+00> : vector<128x128xf32>
    %131 = tpu.matmul %129, %130, %cst_54 {dimension_numbers = #tpu.dot_dimension_numbers<[1], [0], [0], [1], [0, 0, 1, 1], [], []>} : vector<128x128xbf16>, vector<128x128xbf16>, vector<128x128xf32> -> vector<128x128xf32>
    %132 = vector.broadcast %7 : vector<1x128xf32> to vector<128x128xf32>
    %133 = arith.addf %131, %132 : vector<128x128xf32>
    %cst_55 = arith.constant 0.000000e+00 : f32
    %134 = vector.broadcast %cst_55 : f32 to vector<128x128xf32>
    %135 = arith.maximumf %133, %134 : vector<128x128xf32>
    %136 = vector.broadcast %15 : vector<128x1xf32> to vector<128x128xf32>
    %137 = arith.mulf %135, %136 : vector<128x128xf32>
    %cst_56 = arith.constant dense<0.000000e+00> : vector<128xf32>
    %138 = vector.multi_reduction <add>, %137, %cst_56 [0] : vector<128x128xf32> to vector<128xf32>
    %139 = vector.shape_cast %138 : vector<128xf32> to vector<1x128xf32>
    %cst_57 = arith.constant 6.250000e-02 : f32
    %140 = vector.broadcast %cst_57 : f32 to vector<1x128xf32>
    %141 = arith.mulf %139, %140 : vector<1x128xf32>
    %142 = vector.broadcast %141 : vector<1x128xf32> to vector<128x128xf32>
    %143 = arith.subf %135, %142 : vector<128x128xf32>
    %144 = vector.broadcast %15 : vector<128x1xf32> to vector<128x128xf32>
    %145 = arith.mulf %143, %144 : vector<128x128xf32>
    %146 = arith.mulf %145, %145 : vector<128x128xf32>
    %cst_58 = arith.constant dense<0.000000e+00> : vector<128xf32>
    %147 = vector.multi_reduction <add>, %146, %cst_58 [0] : vector<128x128xf32> to vector<128xf32>
    %148 = vector.shape_cast %147 : vector<128xf32> to vector<1x128xf32>
    %cst_59 = arith.constant 6.250000e-02 : f32
    %149 = vector.broadcast %cst_59 : f32 to vector<1x128xf32>
    %150 = arith.mulf %148, %149 : vector<1x128xf32>
    %151 = vector.broadcast %141 : vector<1x128xf32> to vector<128x128xf32>
    %152 = arith.subf %135, %151 : vector<128x128xf32>
    %cst_60 = arith.constant 9.99999974E-6 : f32
    %153 = vector.broadcast %cst_60 : f32 to vector<1x128xf32>
    %154 = arith.addf %150, %153 : vector<1x128xf32>
    %155 = math.rsqrt %154 : vector<1x128xf32>
    %156 = vector.broadcast %155 : vector<1x128xf32> to vector<128x128xf32>
    %157 = arith.mulf %152, %156 : vector<128x128xf32>
    %158 = vector.broadcast %8 : vector<1x128xf32> to vector<128x128xf32>
    %159 = arith.mulf %157, %158 : vector<128x128xf32>
    %160 = vector.broadcast %9 : vector<1x128xf32> to vector<128x128xf32>
    %161 = arith.addf %159, %160 : vector<128x128xf32>
    %162 = arith.truncf %161 : vector<128x128xf32> to vector<128x128xbf16>
    %c0_61 = arith.constant 0 : index
    %c0_62 = arith.constant 0 : index
    %163 = vector.load %arg8[%c0_61, %c0_62] : memref<128x128xbf16, #tpu.memory_space<vmem>>, vector<128x128xbf16>
    %cst_63 = arith.constant dense<0.000000e+00> : vector<128x128xf32>
    %164 = tpu.matmul %162, %163, %cst_63 {dimension_numbers = #tpu.dot_dimension_numbers<[1], [0], [0], [1], [0, 0, 1, 1], [], []>} : vector<128x128xbf16>, vector<128x128xbf16>, vector<128x128xf32> -> vector<128x128xf32>
    %165 = vector.broadcast %10 : vector<1x128xf32> to vector<128x128xf32>
    %166 = arith.addf %164, %165 : vector<128x128xf32>
    %167 = tpu.iota {dimensions = array<i32: 1>} : vector<128x128xi32>
    %c8_i32 = arith.constant 8 : i32
    %168 = vector.broadcast %c8_i32 : i32 to vector<128x128xi32>
    %169 = arith.cmpi slt, %167, %168 : vector<128x128xi32>
    %cst_64 = arith.constant -1.000000e+30 : f32
    %170 = vector.broadcast %cst_64 : f32 to vector<128x128xf32>
    %171 = arith.select %169, %166, %170 : vector<128x128xi1>, vector<128x128xf32>
    %cst_65 = arith.constant dense<0xFF800000> : vector<128xf32>
    %172 = vector.multi_reduction <maximumf>, %171, %cst_65 [1] : vector<128x128xf32> to vector<128xf32>
    %173 = vector.shape_cast %172 : vector<128xf32> to vector<128x1xf32>
    %174 = vector.broadcast %173 : vector<128x1xf32> to vector<128x128xf32>
    %175 = arith.subf %171, %174 : vector<128x128xf32>
    %176 = math.exp %175 : vector<128x128xf32>
    %cst_66 = arith.constant dense<0.000000e+00> : vector<128xf32>
    %177 = vector.multi_reduction <add>, %176, %cst_66 [1] : vector<128x128xf32> to vector<128xf32>
    %178 = vector.shape_cast %177 : vector<128xf32> to vector<128x1xf32>
    %179 = math.log %178 : vector<128x1xf32>
    %180 = vector.broadcast %179 : vector<128x1xf32> to vector<128x128xf32>
    %181 = arith.subf %175, %180 : vector<128x128xf32>
    %c0_67 = arith.constant 0 : index
    %c0_68 = arith.constant 0 : index
    %182 = vector.load %arg10[%c0_67, %c0_68] : memref<128x128xf32, #tpu.memory_space<vmem>>, vector<128x128xf32>
    tpu.vector_store %arg10[%c0_67, %c0_68], %181 {strides = array<i32>} : memref<128x128xf32, #tpu.memory_space<vmem>>, vector<128x128xf32>,
    return
  }
}

</mosaic_0001>

<bundles_post_ra>
// kernel: tpu_custom_call.1
= control target key start
LH: loop header
LB: loop body
LE: loop exit
PB: predicated region body
PF: predicated region fallthrough
CT: control target
= control target key end

     0   :  { %15 = vsyncpa [#allocation7], 0  ;;  %s4185_s0 = inlined_call_operand.vmem [shape: bf16[128,128], index: 0, kind: input, shape index: {}]   ;;  %s4186_s1 = inlined_call_operand.vmem [shape: bf16[128,128], index: 1, kind: input, shape index: {}]   ;;  %s4187_s2 = inlined_call_operand.vmem [shape: f32[128,1], index: 2, kind: input, shape index: {}]   ;;  %s4188_s3 = inlined_call_operand.hbm [shape: bf16[128,128], index: 3, kind: input, shape index: {}]   ;;  %s4189_s4 = inlined_call_operand.hbm [shape: bf16[128,128], index: 4, kind: input, shape index: {}]   ;;  %s4190_s5 = inlined_call_operand.hbm [shape: bf16[128,128], index: 5, kind: input, shape index: {}]   ;;  %s4191_s6 = inlined_call_operand.hbm [shape: bf16[128,128], index: 6, kind: input, shape index: {}]   ;;  %s4192_s7 = inlined_call_operand.hbm [shape: bf16[128,128], index: 7, kind: input, shape index: {}]   ;;  %s4193_s8 = inlined_call_operand.hbm [shape: bf16[128,128], index: 8, kind: input, shape index: {}]   ;;  %s4194_s9 = inlined_call_operand.hbm [shape: f32[16,128], index: 9, kind: input, shape index: {}]   ;;  %s4195_s10 = inlined_call_operand.hbm [shape: f32[128,128], index: 10, kind: output, shape index: {}]  }
   0x1   :  { %16 = vsyncpa [#allocation10], 0 }
   0x2   :  { %17 = vsyncpa [#allocation13], 0 }
   0x3   :  { %18 = vsyncpa [#allocation16], 0 }
   0x4   :  { %19 = vsyncpa [#allocation8], 0  ;;  %s41_s15 = sshll.u32 %s4189_s4, 4  ;;  %s3115_s16 = smov [#allocation9]   ;;  %s42_s15 = int_to_ptr.hbm [resolvable:$true] %s41_s15 }
   0x5   :  { %s43_s17 = sshll.u32 %s3115_s16, 4  ;;  %s67_s20 = sshll.u32 %s4191_s6, 4  ;;  %s44_s17 = int_to_ptr.vmem [resolvable:$true] %s43_s17  ;;  %s68_s20 = int_to_ptr.hbm [resolvable:$true] %s67_s20 }
   0x6   :  { %s3116_s21 = smov 64   ;;  %s3117_s22 = smov 4  }
   0x7   :  { %49 = dma.hbm_to_vmem [thread:$0]  %s42_s15, 1024, %s44_s17, [#allocation10], %s3116_s21, %s3116_s21, %s3117_s22  }
   0x8   :  { %s3118_s23 = smov [#allocation12]   ;;  %s93_s4 = sshll.u32 %s4193_s8, 4  ;;  %s94_s4 = int_to_ptr.hbm [resolvable:$true] %s93_s4 }
   0x9   :  { %s69_s24 = sshll.u32 %s3118_s23, 4  ;;  %s28_s28 = sshll.u32 %s4188_s3, 4  ;;  %s70_s24 = int_to_ptr.vmem [resolvable:$true] %s69_s24  ;;  %s29_s28 = int_to_ptr.hbm [resolvable:$true] %s28_s28 }
   0xa   :  { %75 = dma.hbm_to_vmem [thread:$0]  %s68_s20, 1024, %s70_s24, [#allocation13], %s3116_s21, %s3116_s21, %s3117_s22  }
   0xb   :  { %s3119_s29 = smov [#allocation15]   ;;  %s3120_s11 = smov [#allocation6]  }
   0xc   :  { %s95_s30 = sshll.u32 %s3119_s29, 4  ;;  %s30_s8 = sshll.u32 %s3120_s11, 4  ;;  %s96_s30 = int_to_ptr.vmem [resolvable:$true] %s95_s30  ;;  %s31_s8 = int_to_ptr.vmem [resolvable:$true] %s30_s8 }
   0xd   :  { %101 = dma.hbm_to_vmem [thread:$0]  %s94_s4, 1024, %s96_s30, [#allocation16], %s3116_s21, %s3116_s21, %s3117_s22  }
   0xe   :  { %s54_s14 = sshll.u32 %s4190_s5, 4  ;;  %s80_s16 = sshll.u32 %s4192_s7, 4  ;;  %s55_s14 = int_to_ptr.hbm [resolvable:$true] %s54_s14  ;;  %s81_s16 = int_to_ptr.hbm [resolvable:$true] %s80_s16 }
   0xf   :  { %36 = dma.hbm_to_vmem [thread:$0]  %s29_s28, 1024, %s31_s8, [#allocation7], %s3116_s21, %s3116_s21, %s3117_s22  }
  0x10   :  { %s3121_s17 = smov [#allocation11]   ;;  %s3122_s19 = smov [#allocation14]  }
  0x11   :  { %s56_s18 = sshll.u32 %s3121_s17, 4  ;;  %s82_s5 = sshll.u32 %s3122_s19, 4  ;;  %s57_s18 = int_to_ptr.vmem [resolvable:$true] %s56_s18  ;;  %s83_s5 = int_to_ptr.vmem [resolvable:$true] %s82_s5 }
  0x12   :  { %62 = dma.hbm_to_vmem [thread:$0]  %s55_s14, 1024, %s57_s18, [#allocation10], %s3116_s21, %s3116_s21, %s3117_s22  }
  0x13   :  { %s106_s24 = sshll.u32 %s4194_s9, 4  ;;  %s3123_s7 = smov [#allocation17]   ;;  %s107_s24 = int_to_ptr.hbm [resolvable:$true] %s106_s24 }
  0x14   :  { %88 = dma.hbm_to_vmem [thread:$0]  %s81_s16, 1024, %s83_s5, [#allocation13], %s3116_s21, %s3116_s21, %s3117_s22  }
  0x15   :  { %s108_s25 = sshll.u32 %s3123_s7, 4  ;;  %s3124_s26 = smov 128   ;;  %s109_s25 = int_to_ptr.vmem [resolvable:$true] %s108_s25 }
  0x16   :  { %s3125_s4 = smov 8  }
  0x17   :  { %114 = dma.hbm_to_vmem [thread:$0]  %s107_s24, 256, %s109_s25, [#allocation16], %s3124_s26, %s3124_s26, %s3125_s4  }
  0x18   :  { %3103 = dma.done.wait [#allocation7], 1024  }
  0x19   :  { %3104 = vsyncadd [#allocation7], 4294966272 }
  0x1a   :  { %3105 = dma.done.wait [#allocation10], 2048  }
  0x1b   :  { %3106 = vsyncadd [#allocation10], 4294965248 }
  0x1c   :  { %3107 = dma.done.wait [#allocation13], 2048  }
  0x1d   :  { %3108 = vsyncadd [#allocation13], 4294965248 }
  0x1e   :  { %3109 = dma.done.wait [#allocation16], 1280  }
  0x1f   :  { %3110 = vsyncadd [#allocation16], 4294966016  ;;  %v3225_v0 = vld [vmem:[#allocation17] sm:$0xff]  ;;  %v3227_v1 = vld [vmem:[#allocation17 + $0x8] sm:$0xff] }
  0x20   :  { %v220_v2 = vld [vmem:[%s4186_s1] sm:$0xff]  ;;  %v222_v3 = vld [vmem:[%s4186_s1 + $0x8] sm:$0xff]  ;;  %v224_v4 = vld [vmem:[%s4186_s1 + $0x10] sm:$0xff] }
  0x21   :  { %221 = vst [vmem:[#allocation2 + $0x30] sm:$0xff] %v220_v2  ;;  %v226_v5 = vld [vmem:[%s4186_s1 + $0x18] sm:$0xff]  ;;  %v228_v6 = vld [vmem:[%s4186_s1 + $0x20] sm:$0xff]  ;;  %v230_v7 = vld [vmem:[%s4186_s1 + $0x28] sm:$0xff] }
  0x22   :  { %223 = vst [vmem:[#allocation2] sm:$0xff] %v222_v3  ;;  %v232_v8 = vld [vmem:[%s4186_s1 + $0x30] sm:$0xff]  ;;  %v234_v9 = vld [vmem:[%s4186_s1 + $0x38] sm:$0xff] }
  0x23   :  { %225 = vst [vmem:[#allocation2 + $0x18] sm:$0xff] %v224_v4 }
  0x24   :  { %227 = vst [vmem:[#allocation2 + $0x10] sm:$0xff] %v226_v5 }
  0x25   :  { %229 = vst [vmem:[#allocation2 + $0x8] sm:$0xff] %v228_v6 }
  0x26   :  { %231 = vst [vmem:[#allocation2 + $0x20] sm:$0xff] %v230_v7 }
  0x27   :  { %233 = vst [vmem:[#allocation2 + $0x28] sm:$0xff] %v232_v8 }
  0x28   :  { %235 = vst [vmem:[#allocation2 + $0x38] sm:$0xff] %v234_v9 }
  0x29   :  { %241 = vsyncadd [#allocation5], 1024  ;;  %v3256_v10 = vld [vmem:[%s4185_s0] sm:$0xf]  ;;  %v3261_v11 = vld [vmem:[%s4185_s0] sm:$0xf0] }
  0x2a   :  { %v3266_v12 = vld [vmem:[%s4185_s0 + $0x8] sm:$0xf]  ;;  %v3271_v13 = vld [vmem:[%s4185_s0 + $0x8] sm:$0xf0]  ;;  %v3276_v14 = vld [vmem:[%s4185_s0 + $0x10] sm:$0xf] }
  0x2b   :  { %v3281_v15 = vld [vmem:[%s4185_s0 + $0x10] sm:$0xf0]  ;;  %v3286_v16 = vld [vmem:[%s4185_s0 + $0x18] sm:$0xf]  ;;  %v3291_v17 = vld [vmem:[%s4185_s0 + $0x18] sm:$0xf0] }
  0x2c   :  { %v2474_v18 = vld [vmem:[%s4185_s0 + $0x20] sm:$0xf]  ;;  %v2749_v19 = vld [vmem:[%s4185_s0 + $0x20] sm:$0xf0]  ;;  %v2478_v20 = vld [vmem:[%s4185_s0 + $0x28] sm:$0xf] }
  0x2d   :  { %v2750_v21 = vld [vmem:[%s4185_s0 + $0x28] sm:$0xf0]  ;;  %v2482_v22 = vld [vmem:[%s4185_s0 + $0x30] sm:$0xf]  ;;  %v2751_v23 = vld [vmem:[%s4185_s0 + $0x30] sm:$0xf0] }
  0x2e   :  { %v2486_v24 = vld [vmem:[%s4185_s0 + $0x38] sm:$0xf]  ;;  %v2752_v25 = vld [vmem:[%s4185_s0 + $0x38] sm:$0xf0]  ;;  %v3317_v26 = vld [vmem:[#allocation6] sm:$0xf] }
  0x2f   :  { %v3319_v27 = vld [vmem:[#allocation6] sm:$0xf0]  ;;  %v3321_v28 = vld [vmem:[#allocation6 + $0x8] sm:$0xf]  ;;  %v3323_v29 = vld [vmem:[#allocation6 + $0x8] sm:$0xf0] }
  0x30   :  { %v3325_v30 = vld [vmem:[#allocation6 + $0x10] sm:$0xf]  ;;  %v3327_v31 = vld [vmem:[#allocation6 + $0x10] sm:$0xf0]  ;;  %v3329_v32 = vld [vmem:[#allocation6 + $0x18] sm:$0xf] }
  0x31   :  { %v3331_v33 = vld [vmem:[#allocation6 + $0x18] sm:$0xf0]  ;;  %v3333_v34 = vld [vmem:[#allocation6 + $0x20] sm:$0xf]  ;;  %v3335_v35 = vld [vmem:[#allocation6 + $0x20] sm:$0xf0] }
  0x32   :  { %v3337_v36 = vld [vmem:[#allocation6 + $0x28] sm:$0xf]  ;;  %v3339_v37 = vld [vmem:[#allocation6 + $0x28] sm:$0xf0]  ;;  %v3341_v38 = vld [vmem:[#allocation6 + $0x30] sm:$0xf] }
  0x33   :  { %v3343_v39 = vld [vmem:[#allocation6 + $0x30] sm:$0xf0]  ;;  %v3345_v40 = vld [vmem:[#allocation6 + $0x38] sm:$0xf]  ;;  %v3347_v41 = vld [vmem:[#allocation6 + $0x38] sm:$0xf0] }
  0x34   :  { %v3349_v42 = vld [vmem:[#allocation9] sm:$0xf]  ;;  %v3351_v43 = vld [vmem:[#allocation9] sm:$0xf0]  ;;  %v3353_v44 = vld [vmem:[#allocation9 + $0x8] sm:$0xf] }
  0x35   :  { %v3355_v45 = vld [vmem:[#allocation9 + $0x8] sm:$0xf0]  ;;  %v3357_v46 = vld [vmem:[#allocation9 + $0x10] sm:$0xf]  ;;  %v3359_v47 = vld [vmem:[#allocation9 + $0x10] sm:$0xf0] }
  0x36   :  { %v3361_v48 = vld [vmem:[#allocation9 + $0x18] sm:$0xf]  ;;  %v3363_v49 = vld [vmem:[#allocation9 + $0x18] sm:$0xf0]  ;;  %v3365_v50 = vld [vmem:[#allocation9 + $0x20] sm:$0xf] }
  0x37   :  { %v3367_v51 = vld [vmem:[#allocation9 + $0x20] sm:$0xf0]  ;;  %v3369_v52 = vld [vmem:[#allocation9 + $0x28] sm:$0xf]  ;;  %v3371_v53 = vld [vmem:[#allocation9 + $0x28] sm:$0xf0] }
  0x38   :  { %v3373_v54 = vld [vmem:[#allocation9 + $0x30] sm:$0xf]  ;;  %v3375_v55 = vld [vmem:[#allocation9 + $0x30] sm:$0xf0]  ;;  %v3377_v56 = vld [vmem:[#allocation9 + $0x38] sm:$0xf] }
  0x39   :  { %v3379_v57 = vld [vmem:[#allocation9 + $0x38] sm:$0xf0] }
  0x3a   :  { %3111 = dma.done.wait [#allocation5], 1024 }
  0x3b   :  { %3112 = vsyncadd [#allocation5], 4294966272  ;;  %v2487_v58 = vor.u32 %v2752_v25, %v2486_v24  ;;  %v3126_v59 = vmov 0   ;;  %v2483_v60 = vor.u32 %v2751_v23, %v2482_v22  ;;  %v2479_v61 = vor.u32 %v2750_v21, %v2478_v20  ;;  %v457_v62 = vld [vmem:[%s4187_s2 + $0x10] sm:$0xff]  ;;  %v455_v63 = vld [vmem:[%s4187_s2] sm:$0xff]  ;;  %s2398_s20 = sshll.u32 %s4195_s10, 4  ;;  %s2399_s20 = int_to_ptr.hbm [resolvable:$true] %s2398_s20 }
  0x3c   :  { %2839 = vset.pattern.permute.xlu1 %v3126_v59  ;;  %2838 = vset.pattern.permute.xlu0 %v3126_v59  ;;  %v459_v2 = vld [vmem:[%s4187_s2 + $0x20] sm:$0xff]  ;;  %v2475_v3 = vor.u32 %v2749_v19, %v2474_v18  ;;  %v458_v4 = vld [vmem:[%s4187_s2 + $0x18] sm:$0xff]  ;;  %v456_v5 = vld [vmem:[%s4187_s2 + $0x8] sm:$0xff]  ;;  %v2471_v6 = vor.u32 %v3291_v17, %v3286_v16  ;;  %v2467_v8 = vor.u32 %v3281_v15, %v3276_v14 }
  0x3d   :  { %406 = vmatpush.bf16.msra.mxu0 %v2487_v58  ;;  %2840 = vset.pattern.permute.xlu2 %v3126_v59  ;;  %v460_v7 = vld [vmem:[%s4187_s2 + $0x28] sm:$0xff]  ;;  %v462_v9 = vld [vmem:[%s4187_s2 + $0x38] sm:$0xff]  ;;  %v461_v18 = vld [vmem:[%s4187_s2 + $0x30] sm:$0xff]  ;;  %v2463_v16 = vor.u32 %v3271_v13, %v3266_v12  ;;  %v2459_v14 = vor.u32 %v3261_v11, %v3256_v10  ;;  %v2551_v58 = vor.u32 %v3379_v57, %v3377_v56 }
  0x3e   :  { %483 = vperm.xlu1 %2839, %v457_v62   ;;  %473 = vperm.xlu0 %2838, %v455_v63   ;;  %v463_v17 = vld [vmem:[%s4187_s2 + $0x40] sm:$0xff]  ;;  %v465_v15 = vld [vmem:[%s4187_s2 + $0x50] sm:$0xff]  ;;  %v464_v19 = vld [vmem:[%s4187_s2 + $0x48] sm:$0xff]  ;;  %v2583_v59 = vor.u32 %v3347_v41, %v3345_v40  ;;  %v2575_v56 = vor.u32 %v3339_v37, %v3337_v36  ;;  %v2539_v40 = vor.u32 %v3367_v51, %v3365_v50 }
  0x3f   :  { %493 = vperm.xlu2 %2840, %v459_v2   ;;  %v2769_v12 = vld [vmem:[#allocation2 + $0x30] sm:$0xff]  ;;  %v466_v13 = vld [vmem:[%s4187_s2 + $0x58] sm:$0xff]  ;;  %v468_v10 = vld [vmem:[%s4187_s2 + $0x68] sm:$0xff]  ;;  %687 = vmatpush.bf16.msra.mxu1 %v2551_v58  ;;  %v2571_v41 = vor.u32 %v3335_v35, %v3333_v34  ;;  %v2563_v37 = vor.u32 %v3327_v31, %v3325_v30  ;;  %v2527_v34 = vor.u32 %v3355_v45, %v3353_v44 }
  0x40   :  { %v467_v11 = vld [vmem:[%s4187_s2 + $0x60] sm:$0xff]  ;;  %v469_v20 = vld [vmem:[%s4187_s2 + $0x70] sm:$0xff]  ;;  %v470_v21 = vld [vmem:[%s4187_s2 + $0x78] sm:$0xff]  ;;  %784 = vmatpush.bf16.msra.mxu2 %v2583_v59  ;;  %v2559_v35 = vor.u32 %v3323_v29, %v3321_v28 }
  0x41   :  { %407 = vmatpush.bf16.msra.mxu0 %v2483_v60  ;;  %v2770_v22 = vld [vmem:[#allocation2] sm:$0xff]  ;;  %v2771_v23 = vld [vmem:[#allocation2 + $0x18] sm:$0xff]  ;;  %v2772_v24 = vld [vmem:[#allocation2 + $0x10] sm:$0xff]  ;;  %v2547_v60 = vor.u32 %v3375_v55, %v3373_v54 }
  0x42   :  { %v2773_v25 = vld [vmem:[#allocation2 + $0x8] sm:$0xff]  ;;  %v2777_v30 = vld [vmem:[%s4185_s0] sm:$0xff]  ;;  %v2776_v31 = vld [vmem:[#allocation2 + $0x38] sm:$0xff] }
  0x43   :  { %688 = vmatpush.bf16.msra.mxu1 %v2547_v60  ;;  %v2775_v36 = vld [vmem:[#allocation2 + $0x28] sm:$0xff]  ;;  %v2780_v54 = vld [vmem:[%s4185_s0 + $0x18] sm:$0xff] }
  0x44   :  { %v2778_v28 = vld [vmem:[%s4185_s0 + $0x8] sm:$0xff] }
  0x45   :  { %408 = vmatpush.bf16.msra.mxu0 %v2479_v61  ;;  %v2579_v61 = vor.u32 %v3343_v39, %v3341_v38  ;;  %v2535_v38 = vor.u32 %v3363_v49, %v3361_v48  ;;  %v2567_v39 = vor.u32 %v3331_v33, %v3329_v32  ;;  %v2523_v32 = vor.u32 %v3351_v43, %v3349_v42 }
  0x46   :  { %488 = vperm.xlu1 %2839, %v458_v4   ;;  %478 = vperm.xlu0 %2838, %v456_v5   ;;  %v2555_v33 = vor.u32 %v3319_v27, %v3317_v26  ;;  %v2779_v26 = vld [vmem:[%s4185_s0 + $0x10] sm:$0xff] }
  0x47   :  { %498 = vperm.xlu2 %2840, %v460_v7   ;;  %785 = vmatpush.bf16.msra.mxu2 %v2579_v61 }
  0x49   :  { %409 = vmatpush.bf16.msra.mxu0 %v2475_v3 }
  0x4b   :  { %786 = vmatpush.bf16.msra.mxu2 %v2575_v56 }
  0x4d   :  { %410 = vmatpush.bf16.msra.mxu0 %v2471_v6 }
  0x4e   :  { %508 = vperm.xlu1 %2839, %v462_v9   ;;  %503 = vperm.xlu0 %2838, %v461_v18  }
  0x4f   :  { %513 = vperm.xlu2 %2840, %v463_v17   ;;  %787 = vmatpush.bf16.msra.mxu2 %v2571_v41 }
  0x51   :  { %411 = vmatpush.bf16.msra.mxu0 %v2467_v8 }
  0x53   :  { %788 = vmatpush.bf16.msra.mxu2 %v2567_v39 }
  0x55   :  { %412 = vmatpush.bf16.msra.mxu0 %v2463_v16 }
  0x56   :  { %523 = vperm.xlu1 %2839, %v465_v15   ;;  %518 = vperm.xlu0 %2838, %v464_v19  }
  0x57   :  { %528 = vperm.xlu2 %2840, %v466_v13   ;;  %789 = vmatpush.bf16.msra.mxu2 %v2563_v37 }
  0x59   :  { %413 = vmatpush.bf16.msra.mxu0 %v2459_v14 }
  0x5b   :  { %790 = vmatpush.bf16.msra.mxu2 %v2559_v35 }
  0x5c   :  { %414 = vmatmul.bf16.vlgmr.msra.gmra.mxu0 %v2769_v12 }
  0x5e   :  { %538 = vperm.xlu1 %2839, %v468_v10   ;;  %533 = vperm.xlu0 %2838, %v467_v11  }
  0x5f   :  { %543 = vperm.xlu2 %2840, %v469_v20   ;;  %791 = vmatpush.bf16.msra.mxu2 %v2555_v33 }
  0x66   :  { %1206 = vperm.xlu1 %2839, %v455_v63   ;;  %548 = vperm.xlu0 %2838, %v470_v21   ;;  %v2543_v63 = vor.u32 %v3371_v53, %v3369_v52  ;;  %v2531_v52 = vor.u32 %v3359_v47, %v3357_v46 }
  0x67   :  { %1211 = vperm.xlu2 %2840, %v456_v5  }
  0x68   :  { %689 = vmatpush.bf16.msra.mxu1 %v2543_v63  ;;  %v2784_v63 = vld [vmem:[%s4185_s0 + $0x38] sm:$0xff] }
  0x6c   :  { %419 = vmatmul.bf16.gmra.mxu0 %v2770_v22  ;;  %690 = vmatpush.bf16.msra.mxu1 %v2539_v40 }
  0x6e   :  { %1221 = vperm.xlu1 %2839, %v458_v4   ;;  %1216 = vperm.xlu0 %2838, %v457_v62   ;;  %v2774_v62 = vld [vmem:[#allocation2 + $0x20] sm:$0xff] }
  0x6f   :  { %1226 = vperm.xlu2 %2840, %v459_v2  }
  0x70   :  { %691 = vmatpush.bf16.msra.mxu1 %v2535_v38 }
  0x74   :  { %692 = vmatpush.bf16.msra.mxu1 %v2531_v52 }
  0x76   :  { %1236 = vperm.xlu1 %2839, %v461_v18   ;;  %1231 = vperm.xlu0 %2838, %v460_v7   ;;  %v2781_v7 = vld [vmem:[%s4185_s0 + $0x20] sm:$0xff] }
  0x77   :  { %1241 = vperm.xlu2 %2840, %v462_v9  }
  0x78   :  { %693 = vmatpush.bf16.msra.mxu1 %v2527_v34 }
  0x7c   :  { %424 = vmatmul.bf16.gmra.mxu0 %v2771_v23  ;;  %694 = vmatpush.bf16.msra.mxu1 %v2523_v32  ;;  %v2783_v23 = vld [vmem:[%s4185_s0 + $0x30] sm:$0xff] }
  0x7e   :  { %1251 = vperm.xlu1 %2839, %v464_v19   ;;  %1246 = vperm.xlu0 %2838, %v463_v17   ;;  %v2782_v19 = vld [vmem:[%s4185_s0 + $0x28] sm:$0xff]  ;;  %s3127_s0 = smov [#allocation18]  }
  0x7f   :  { %1256 = vperm.xlu2 %2840, %v465_v15   ;;  %695 = vmatmul.bf16.vlgmr.msra.gmra.mxu1 %v2777_v30  ;;  %s2396_s18 = sshll.u32 %s3127_s0, 4  ;;  %s2397_s18 = int_to_ptr.vmem [resolvable:$true] %s2396_s18 }
  0x86   :  { %1266 = vperm.xlu1 %2839, %v467_v11   ;;  %1261 = vperm.xlu0 %2838, %v466_v13  }
  0x87   :  { %1271 = vperm.xlu2 %2840, %v468_v10  }
  0x8c   :  { %429 = vmatmul.bf16.gmra.mxu0 %v2772_v24 }
  0x8e   :  { %1281 = vperm.xlu1 %2839, %v470_v21   ;;  %1276 = vperm.xlu0 %2838, %v469_v20  }
  0x8f   :  { %700 = vmatmul.bf16.gmra.mxu1 %v2778_v28 }
  0x99   :  { %v494_v57 = vpop.permute.xlu2 %493 }
  0x9c   :  { %434 = vmatmul.bf16.gmra.mxu0 %v2773_v25 }
  0x9f   :  { %705 = vmatmul.bf16.gmra.mxu1 %v2779_v26 }
  0xa1   :  { %v499_v3 = vpop.permute.xlu2 %498 }
  0xa9   :  { %v514_v10 = vpop.permute.xlu2 %513 }
  0xac   :  { %439 = vmatmul.bf16.gmra.mxu0 %v2774_v62 }
  0xaf   :  { %710 = vmatmul.bf16.gmra.mxu1 %v2780_v54 }
  0xb0   :  { %v474_v29 = vpop.permute.xlu0 %473  ;;  %v484_v47 = vpop.permute.xlu1 %483 }
  0xb1   :  { %v529_v58 = vpop.permute.xlu2 %528 }
  0xb8   :  { %v479_v43 = vpop.permute.xlu0 %478  ;;  %v489_v49 = vpop.permute.xlu1 %488 }
  0xb9   :  { %v544_v32 = vpop.permute.xlu2 %543 }
  0xbc   :  { %444 = vmatmul.bf16.gmra.mxu0 %v2775_v36 }
  0xbf   :  { %715 = vmatmul.bf16.gmra.mxu1 %v2781_v7 }
  0xc0   :  { %v509_v18 = vpop.permute.xlu1 %508  ;;  %v504_v16 = vpop.permute.xlu0 %503 }
  0xc8   :  { %v519_v11 = vpop.permute.xlu0 %518  ;;  %v524_v59 = vpop.permute.xlu1 %523 }
  0xcc   :  { %449 = vmatmul.bf16.gmra.mxu0 %v2776_v31 }
  0xcf   :  { %720 = vmatmul.bf16.gmra.mxu1 %v2782_v19 }
  0xd0   :  { %v539_v41 = vpop.permute.xlu1 %538  ;;  %v534_v38 = vpop.permute.xlu0 %533 }
  0xd8   :  { %v549_v33 = vpop.permute.xlu0 %548 }
  0xd9   :  { %v415_v42 = vpop.f32.mrf.mxu0 }
  0xda   :  { %v551_v45 = vmul.f32 %v474_v29, %v415_v42 }
  0xdf   :  { %725 = vmatmul.bf16.gmra.mxu1 %v2783_v23 }
  0xe1   :  { %v417_v44 = vpop.f32.mrf.mxu0 }
  0xe2   :  { %v552_v46 = vmul.f32 %v479_v43, %v417_v44 }
  0xe4   :  { %v567_v27 = vpack.c.bf16 %v552_v46, %v551_v45 }
  0xe6   :  { %792 = vmatmul.bf16.vlgmr.msra.gmra.mxu2 %v567_v27 }
  0xe9   :  { %v420_v48 = vpop.f32.mrf.mxu0 }
  0xea   :  { %v553_v51 = vmul.f32 %v484_v47, %v420_v48  ;;  %v3494_v48 = vperm.slane %v3225_v0, 0 }
  0xef   :  { %730 = vmatmul.bf16.gmra.mxu1 %v2784_v63 }
  0xf1   :  { %v422_v50 = vpop.f32.mrf.mxu0 }
  0xf2   :  { %v554_v53 = vmul.f32 %v489_v49, %v422_v50 }
  0xf4   :  { %v568_v55 = vpack.c.bf16 %v554_v53, %v553_v51 }
  0xf6   :  { %797 = vmatmul.bf16.gmra.mxu2 %v568_v55 }
  0xf9   :  { %v425_v2 = vpop.f32.mrf.mxu0 }
  0xfa   :  { %v555_v5 = vmul.f32 %v494_v57, %v425_v2 }
  0xfc   :  { %v696_v35 = vpop.f32.mrf.mxu1 }
 0x101   :  { %v427_v4 = vpop.f32.mrf.mxu0 }
 0x102   :  { %v556_v6 = vmul.f32 %v499_v3, %v427_v4 }
 0x104   :  { %v569_v8 = vpack.c.bf16 %v556_v6, %v555_v5  ;;  %v698_v42 = vpop.f32.mrf.mxu1 }
 0x106   :  { %802 = vmatmul.bf16.gmra.mxu2 %v569_v8 }
 0x109   :  { %v430_v9 = vpop.f32.mrf.mxu0 }
 0x10a   :  { %v557_v14 = vmul.f32 %v504_v16, %v430_v9 }
 0x10c   :  { %v701_v43 = vpop.f32.mrf.mxu1 }
 0x111   :  { %v432_v17 = vpop.f32.mrf.mxu0 }
 0x112   :  { %v558_v15 = vmul.f32 %v509_v18, %v432_v17 }
 0x114   :  { %v570_v12 = vpack.c.bf16 %v558_v15, %v557_v14  ;;  %v703_v45 = vpop.f32.mrf.mxu1 }
 0x116   :  { %807 = vmatmul.bf16.gmra.mxu2 %v570_v12 }
 0x119   :  { %v435_v13 = vpop.f32.mrf.mxu0 }
 0x11a   :  { %v559_v21 = vmul.f32 %v514_v10, %v435_v13 }
 0x11c   :  { %v706_v27 = vpop.f32.mrf.mxu1 }
 0x121   :  { %v437_v20 = vpop.f32.mrf.mxu0 }
 0x122   :  { %v560_v22 = vmul.f32 %v519_v11, %v437_v20 }
 0x124   :  { %v571_v24 = vpack.c.bf16 %v560_v22, %v559_v21  ;;  %v708_v55 = vpop.f32.mrf.mxu1 }
 0x126   :  { %812 = vmatmul.bf16.gmra.mxu2 %v571_v24 }
 0x129   :  { %v440_v25 = vpop.f32.mrf.mxu0 }
 0x12a   :  { %v561_v61 = vmul.f32 %v524_v59, %v440_v25 }
 0x12c   :  { %v711_v7 = vpop.f32.mrf.mxu1 }
 0x131   :  { %v442_v60 = vpop.f32.mrf.mxu0 }
 0x132   :  { %v562_v62 = vmul.f32 %v529_v58, %v442_v60 }
 0x134   :  { %v572_v56 = vpack.c.bf16 %v562_v62, %v561_v61  ;;  %v713_v12 = vpop.f32.mrf.mxu1 }
 0x136   :  { %817 = vmatmul.bf16.gmra.mxu2 %v572_v56 }
 0x139   :  { %v445_v40 = vpop.f32.mrf.mxu0 }
 0x13a   :  { %v563_v52 = vmul.f32 %v534_v38, %v445_v40 }
 0x13c   :  { %v716_v10 = vpop.f32.mrf.mxu1 }
 0x141   :  { %v447_v39 = vpop.f32.mrf.mxu0 }
 0x142   :  { %v564_v36 = vmul.f32 %v539_v41, %v447_v39 }
 0x144   :  { %v573_v37 = vpack.c.bf16 %v564_v36, %v563_v52  ;;  %v718_v20 = vpop.f32.mrf.mxu1 }
 0x146   :  { %822 = vmatmul.bf16.gmra.mxu2 %v573_v37 }
 0x149   :  { %v450_v34 = vpop.f32.mrf.mxu0 }
 0x14a   :  { %v565_v31 = vmul.f32 %v544_v32, %v450_v34 }
 0x14c   :  { %v721_v22 = vpop.f32.mrf.mxu1 }
 0x151   :  { %v452_v30 = vpop.f32.mrf.mxu0 }
 0x152   :  { %v566_v28 = vmul.f32 %v549_v33, %v452_v30 }
 0x154   :  { %v574_v29 = vpack.c.bf16 %v566_v28, %v565_v31  ;;  %v723_v24 = vpop.f32.mrf.mxu1 }
 0x156   :  { %827 = vmatmul.bf16.gmra.mxu2 %v574_v29 }
 0x15c   :  { %v726_v59 = vpop.f32.mrf.mxu1 }
 0x164   :  { %v728_v40 = vpop.f32.mrf.mxu1 }
 0x169   :  { %v793_v44 = vpop.f32.mrf.mxu2 }
 0x16a   :  { %v794_v46 = vadd.f32 %v793_v44, %v696_v35 }
 0x16c   :  { %v3500_v53 = vadd.f32 %v3494_v48, %v794_v46 }
 0x171   :  { %v795_v26 = vpop.f32.mrf.mxu2 }
 0x172   :  { %v796_v47 = vadd.f32 %v795_v26, %v698_v42 }
 0x174   :  { %v3497_v50 = vadd.f32 %v3494_v48, %v796_v47 }
 0x176   :  { %v898_v57 = vadd.f32 %v3497_v50, %v3500_v53 }
 0x179   :  { %v798_v49 = vpop.f32.mrf.mxu2 }
 0x17a   :  { %v799_v51 = vadd.f32 %v798_v49, %v701_v43 }
 0x17c   :  { %v3503_v54 = vadd.f32 %v3494_v48, %v799_v51 }
 0x17e   :  { %v884_v2 = vmul.f32 0.0, %v3503_v54 }
 0x180   :  { %v899_v3 = vadd.f32 %v898_v57, %v884_v2 }
 0x181   :  { %v800_v4 = vpop.f32.mrf.mxu2 }
 0x182   :  { %v801_v5 = vadd.f32 %v800_v4, %v703_v45  ;;  %v731_v45 = vpop.f32.mrf.mxu1 }
 0x184   :  { %v3509_v6 = vadd.f32 %v3494_v48, %v801_v5 }
 0x186   :  { %v885_v9 = vmul.f32 0.0, %v3509_v6 }
 0x188   :  { %v900_v17 = vadd.f32 %v899_v3, %v885_v9 }
 0x189   :  { %v803_v8 = vpop.f32.mrf.mxu2 }
 0x18a   :  { %v804_v18 = vadd.f32 %v803_v8, %v706_v27 }
 0x18c   :  { %v3513_v16 = vadd.f32 %v3494_v48, %v804_v18 }
 0x18e   :  { %v886_v14 = vmul.f32 0.0, %v3513_v16 }
 0x190   :  { %v901_v15 = vadd.f32 %v900_v17, %v886_v14  ;;  %v733_v14 = vpop.f32.mrf.mxu1 }
 0x191   :  { %v805_v19 = vpop.f32.mrf.mxu2 }
 0x192   :  { %v806_v60 = vadd.f32 %v805_v19, %v708_v55 }
 0x194   :  { %v3517_v63 = vadd.f32 %v3494_v48, %v806_v60 }
 0x196   :  { %v887_v39 = vmul.f32 0.0, %v3517_v63 }
 0x198   :  { %v902_v33 = vadd.f32 %v901_v15, %v887_v39 }
 0x199   :  { %v808_v13 = vpop.f32.mrf.mxu2 }
 0x19a   :  { %v809_v62 = vadd.f32 %v808_v13, %v711_v7 }
 0x19c   :  { %v3520_v41 = vadd.f32 %v3494_v48, %v809_v62 }
 0x19e   :  { %v888_v34 = vmul.f32 0.0, %v3520_v41 }
 0x1a0   :  { %v903_v29 = vadd.f32 %v902_v33, %v888_v34 }
 0x1a1   :  { %v810_v11 = vpop.f32.mrf.mxu2 }
 0x1a2   :  { %v811_v56 = vadd.f32 %v810_v11, %v713_v12 }
 0x1a4   :  { %v3524_v52 = vadd.f32 %v3494_v48, %v811_v56 }
 0x1a6   :  { %v889_v30 = vmul.f32 0.0, %v3524_v52 }
 0x1a8   :  { %v904_v46 = vadd.f32 %v903_v29, %v889_v30 }
 0x1a9   :  { %v813_v21 = vpop.f32.mrf.mxu2 }
 0x1aa   :  { %v814_v38 = vadd.f32 %v813_v21, %v716_v10 }
 0x1ac   :  { %v3528_v35 = vadd.f32 %v3494_v48, %v814_v38 }
 0x1ae   :  { %v890_v42 = vmul.f32 0.0, %v3528_v35 }
 0x1b0   :  { %v905_v51 = vadd.f32 %v904_v46, %v890_v42 }
 0x1b1   :  { %v815_v23 = vpop.f32.mrf.mxu2 }
 0x1b2   :  { %v816_v36 = vadd.f32 %v815_v23, %v718_v20 }
 0x1b4   :  { %v3532_v31 = vadd.f32 %v3494_v48, %v816_v36 }
 0x1b6   :  { %v891_v26 = vmul.f32 0.0, %v3532_v31 }
 0x1b8   :  { %v906_v3 = vadd.f32 %v905_v51, %v891_v26 }
 0x1b9   :  { %v818_v25 = vpop.f32.mrf.mxu2 }
 0x1ba   :  { %v819_v32 = vadd.f32 %v818_v25, %v721_v22 }
 0x1bc   :  { %v3536_v43 = vadd.f32 %v3494_v48, %v819_v32 }
 0x1be   :  { %v892_v55 = vmul.f32 0.0, %v3536_v43 }
 0x1c0   :  { %v907_v7 = vadd.f32 %v906_v3, %v892_v55 }
 0x1c1   :  { %v820_v58 = vpop.f32.mrf.mxu2 }
 0x1c2   :  { %v821_v28 = vadd.f32 %v820_v58, %v723_v24 }
 0x1c4   :  { %v3540_v27 = vadd.f32 %v3494_v48, %v821_v28 }
 0x1c6   :  { %v893_v4 = vmul.f32 0.0, %v3540_v27 }
 0x1c8   :  { %v908_v18 = vadd.f32 %v907_v7, %v893_v4 }
 0x1c9   :  { %v823_v61 = vpop.f32.mrf.mxu2 }
 0x1ca   :  { %v824_v44 = vadd.f32 %v823_v61, %v726_v59 }
 0x1cc   :  { %v3544_v57 = vadd.f32 %v3494_v48, %v824_v44 }
 0x1ce   :  { %v894_v8 = vmul.f32 0.0, %v3544_v57 }
 0x1d0   :  { %v909_v19 = vadd.f32 %v908_v18, %v894_v8  ;;  %v2807_v18 = vld [vmem:[#allocation12 + $0x30] sm:$0xff] }
 0x1d1   :  { %v825_v37 = vpop.f32.mrf.mxu2 }
 0x1d2   :  { %v826_v47 = vadd.f32 %v825_v37, %v728_v40 }
 0x1d4   :  { %v3548_v5 = vadd.f32 %v3494_v48, %v826_v47 }
 0x1d6   :  { %v895_v17 = vmul.f32 0.0, %v3548_v5 }
 0x1d8   :  { %v910_v10 = vadd.f32 %v909_v19, %v895_v17 }
 0x1d9   :  { %v828_v49 = vpop.f32.mrf.mxu2 }
 0x1da   :  { %v829_v2 = vadd.f32 %v828_v49, %v731_v45 }
 0x1dc   :  { %v3552_v9 = vadd.f32 %v3494_v48, %v829_v2 }
 0x1de   :  { %v896_v12 = vmul.f32 0.0, %v3552_v9 }
 0x1e0   :  { %v911_v20 = vadd.f32 %v910_v10, %v896_v12 }
 0x1e1   :  { %v830_v15 = vpop.f32.mrf.mxu2 }
 0x1e2   :  { %v831_v13 = vadd.f32 %v830_v15, %v733_v14 }
 0x1e4   :  { %v849_v11 = vadd.f32 %v3494_v48, %v831_v13 }
 0x1e6   :  { %v897_v21 = vmul.f32 0.0, %v849_v11 }
 0x1e8   :  { %v912_v22 = vadd.f32 %v911_v20, %v897_v21 }
 0x1ea   :  { %v913_v23 = vrot.slane %v912_v22, 4 }
 0x1ec   :  { %v914_v24 = vadd.f32 %v913_v23, %v912_v22 }
 0x1ee   :  { %v915_v25 = vrot.slane %v914_v24, 2 }
 0x1f0   :  { %v916_v58 = vadd.f32 %v915_v25, %v914_v24 }
 0x1f2   :  { %v917_v59 = vrot.slane %v916_v58, 1 }
 0x1f4   :  { %v918_v60 = vadd.f32 %v917_v59, %v916_v58  ;;  %v2805_v58 = vld [vmem:[#allocation12 + $0x20] sm:$0xff] }
 0x1f6   :  { %v919_v61 = vmul.f32 0.0625, %v918_v60 }
 0x1f8   :  { %v3558_v62 = vsub.f32 %v3500_v53, %v919_v61  ;;  %v3561_v56 = vsub.f32 %v3503_v54, %v919_v61  ;;  %v3564_v40 = vsub.f32 %v3513_v16, %v919_v61  ;;  %v3567_v48 = vsub.f32 %v3497_v50, %v919_v61 }
 0x1f9   :  { %v3570_v38 = vsub.f32 %v3509_v6, %v919_v61  ;;  %v3578_v54 = vsub.f32 %v3517_v63, %v919_v61  ;;  %v3582_v50 = vsub.f32 %v3520_v41, %v919_v61  ;;  %v3586_v32 = vsub.f32 %v3524_v52, %v919_v61 }
 0x1fa   :  { %v938_v39 = vmul.f32 0.0, %v3561_v56  ;;  %v952_v36 = vmul.f32 %v3558_v62, %v3558_v62  ;;  %v953_v53 = vmul.f32 %v3567_v48, %v3567_v48  ;;  %v940_v6 = vmul.f32 0.0, %v3564_v40 }
 0x1fb   :  { %v939_v16 = vmul.f32 0.0, %v3570_v38  ;;  %v941_v33 = vmul.f32 0.0, %v3578_v54  ;;  %v3590_v29 = vsub.f32 %v3528_v35, %v919_v61  ;;  %v942_v63 = vmul.f32 0.0, %v3582_v50  ;;  %v2808_v35 = vld [vmem:[#allocation12 + $0x38] sm:$0xff] }
 0x1fc   :  { %v954_v37 = vmul.f32 %v938_v39, %v938_v39  ;;  %v968_v34 = vadd.f32 %v953_v53, %v952_v36  ;;  %v956_v42 = vmul.f32 %v940_v6, %v940_v6  ;;  %v3594_v41 = vsub.f32 %v3532_v31, %v919_v61  ;;  %1420 = vmatpush.bf16.msrb.mxu0 %v2808_v35  ;;  %v2804_v53 = vld [vmem:[#allocation12 + $0x18] sm:$0xff] }
 0x1fd   :  { %v955_v30 = vmul.f32 %v939_v16, %v939_v16  ;;  %v943_v45 = vmul.f32 0.0, %v3586_v32  ;;  %v957_v46 = vmul.f32 %v941_v33, %v941_v33  ;;  %v3598_v52 = vsub.f32 %v3536_v43, %v919_v61  ;;  %v2802_v33 = vld [vmem:[#allocation12 + $0x8] sm:$0xff] }
 0x1fe   :  { %v969_v28 = vadd.f32 %v968_v34, %v954_v37  ;;  %v944_v47 = vmul.f32 0.0, %v3590_v29  ;;  %v958_v49 = vmul.f32 %v942_v63, %v942_v63  ;;  %v3602_v55 = vsub.f32 %v3540_v27, %v919_v61 }
 0x1ff   :  { %v945_v2 = vmul.f32 0.0, %v3594_v41  ;;  %v959_v3 = vmul.f32 %v943_v45, %v943_v45  ;;  %v3606_v4 = vsub.f32 %v3544_v57, %v919_v61  ;;  %v946_v7 = vmul.f32 0.0, %v3598_v52  ;;  %v2806_v57 = vld [vmem:[#allocation12 + $0x28] sm:$0xff] }
 0x200   :  { %v970_v44 = vadd.f32 %v969_v28, %v955_v30  ;;  %v960_v43 = vmul.f32 %v944_v47, %v944_v47  ;;  %v933_v17 = vsub.f32 %v3548_v5, %v919_v61  ;;  %v947_v14 = vmul.f32 0.0, %v3602_v55  ;;  %1421 = vmatpush.bf16.msrb.mxu0 %v2807_v18  ;;  %v2801_v28 = vld [vmem:[#allocation12] sm:$0xff] }
 0x201   :  { %v961_v15 = vmul.f32 %v945_v2, %v945_v2  ;;  %v934_v19 = vsub.f32 %v3552_v9, %v919_v61  ;;  %v948_v12 = vmul.f32 0.0, %v3606_v4  ;;  %v962_v13 = vmul.f32 %v946_v7, %v946_v7 }
 0x202   :  { %v971_v26 = vadd.f32 %v970_v44, %v956_v42  ;;  %v935_v20 = vsub.f32 %v849_v11, %v919_v61  ;;  %v949_v21 = vmul.f32 0.0, %v933_v17  ;;  %v963_v22 = vmul.f32 %v947_v14, %v947_v14  ;;  %v2803_v11 = vld [vmem:[#allocation12 + $0x10] sm:$0xff] }
 0x203   :  { %v950_v24 = vmul.f32 0.0, %v934_v19  ;;  %v964_v25 = vmul.f32 %v948_v12, %v948_v12  ;;  %v3617_v7 = vperm.slane %v3225_v0, 2 }
 0x204   :  { %v972_v51 = vadd.f32 %v971_v26, %v957_v46  ;;  %1422 = vmatpush.bf16.msrb.mxu0 %v2806_v57  ;;  %v951_v59 = vmul.f32 0.0, %v935_v20  ;;  %v965_v60 = vmul.f32 %v949_v21, %v949_v21 }
 0x205   :  { %v966_v36 = vmul.f32 %v950_v24, %v950_v24 }
 0x206   :  { %v973_v31 = vadd.f32 %v972_v51, %v958_v49  ;;  %v967_v16 = vmul.f32 %v951_v59, %v951_v59 }
 0x208   :  { %v974_v8 = vadd.f32 %v973_v31, %v959_v3  ;;  %1423 = vmatpush.bf16.msrb.mxu0 %v2805_v58  ;;  %v3614_v3 = vperm.slane %v3225_v0, 1 }
 0x20a   :  { %v975_v27 = vadd.f32 %v974_v8, %v960_v43 }
 0x20c   :  { %v976_v10 = vadd.f32 %v975_v27, %v961_v15  ;;  %1424 = vmatpush.bf16.msrb.mxu0 %v2804_v53 }
 0x20e   :  { %v977_v23 = vadd.f32 %v976_v10, %v962_v13 }
 0x210   :  { %v978_v5 = vadd.f32 %v977_v23, %v963_v22  ;;  %1425 = vmatpush.bf16.msrb.mxu0 %v2803_v11 }
 0x212   :  { %v979_v39 = vadd.f32 %v978_v5, %v964_v25 }
 0x214   :  { %v980_v9 = vadd.f32 %v979_v39, %v965_v60  ;;  %1426 = vmatpush.bf16.msrb.mxu0 %v2802_v33 }
 0x216   :  { %v981_v37 = vadd.f32 %v980_v9, %v966_v36 }
 0x218   :  { %v982_v6 = vadd.f32 %v981_v37, %v967_v16  ;;  %1427 = vmatpush.bf16.msrb.mxu0 %v2801_v28 }
 0x21a   :  { %v983_v61 = vrot.slane %v982_v6, 4 }
 0x21c   :  { %v984_v34 = vadd.f32 %v983_v61, %v982_v6 }
 0x21e   :  { %v985_v30 = vrot.slane %v984_v34, 2 }
 0x220   :  { %v986_v63 = vadd.f32 %v985_v30, %v984_v34 }
 0x222   :  { %v987_v42 = vrot.slane %v986_v63, 1 }
 0x224   :  { %v988_v44 = vadd.f32 %v987_v42, %v986_v63 }
 0x226   :  { %v989_v45 = vmul.f32 0.0625, %v988_v44 }
 0x228   :  { %v990_v46 = vadd.f32 1e-05, %v989_v45 }
 0x22a   :  { %2841 = vrsqrt.f32 %v990_v46  ;;  %vm997_vm1 = vweird.f32 %v990_v46 }
 0x230   :  { %v2842_v26 = vpop.eup %2841 }
 0x231   :  { %v992_v47 = vmul.f32 %v2842_v26, %v990_v46  ;;  %vm998_vm0 = vweird.f32 %v2842_v26 }
 0x232   :  { %vm999_vm2 = vmor %vm997_vm1, %vm998_vm0 }
 0x233   :  { %v993_v49 = vmul.f32 %v2842_v26, %v992_v47 }
 0x235   :  { %v994_v51 = vmul.f32 0.5, %v993_v49 }
 0x237   :  { %v995_v35 = vsub.f32 1.5, %v994_v51 }
 0x239   :  { %v996_v2 = vmul.f32 %v2842_v26, %v995_v35 }
 0x23b   :  { %v1000_v31 = vsel %vm999_vm2, %v2842_v26, %v996_v2 }
 0x23c   :  { %v1016_v43 = vmul.f32 %v1000_v31, %v935_v20  ;;  %v1015_v8 = vmul.f32 %v1000_v31, %v934_v19  ;;  %v1001_v18 = vmul.f32 %v1000_v31, %v3558_v62  ;;  %v1002_v14 = vmul.f32 %v1000_v31, %v3567_v48 }
 0x23d   :  { %v1013_v15 = vmul.f32 %v1000_v31, %v3606_v4  ;;  %v1014_v27 = vmul.f32 %v1000_v31, %v933_v17  ;;  %v1011_v12 = vmul.f32 %v1000_v31, %v3598_v52  ;;  %v1012_v13 = vmul.f32 %v1000_v31, %v3602_v55 }
 0x23e   :  { %v1032_v10 = vmul.f32 %v3614_v3, %v1015_v8  ;;  %v1033_v57 = vmul.f32 %v3614_v3, %v1016_v43  ;;  %v1018_v21 = vmul.f32 %v3614_v3, %v1001_v18  ;;  %v1019_v20 = vmul.f32 %v3614_v3, %v1002_v14 }
 0x23f   :  { %v1030_v19 = vmul.f32 %v3614_v3, %v1013_v15  ;;  %v1031_v62 = vmul.f32 %v3614_v3, %v1014_v27  ;;  %v1028_v48 = vmul.f32 %v3614_v3, %v1011_v12  ;;  %v1029_v4 = vmul.f32 %v3614_v3, %v1012_v13 }
 0x240   :  { %v1049_v52 = vadd.f32 %v3617_v7, %v1032_v10  ;;  %v1050_v55 = vadd.f32 %v3617_v7, %v1033_v57  ;;  %v1035_v17 = vadd.f32 %v3617_v7, %v1018_v21  ;;  %v1036_v22 = vadd.f32 %v3617_v7, %v1019_v20  ;;  %v2800_v20 = vld [vmem:[#allocation11 + $0x38] sm:$0xff] }
 0x241   :  { %v1047_v23 = vadd.f32 %v3617_v7, %v1030_v19  ;;  %v1048_v24 = vadd.f32 %v3617_v7, %v1031_v62  ;;  %v1045_v25 = vadd.f32 %v3617_v7, %v1028_v48  ;;  %v1046_v5 = vadd.f32 %v3617_v7, %v1029_v4  ;;  %1517 = vmatpush.bf16.msrb.mxu1 %v2800_v20  ;;  %v2799_v62 = vld [vmem:[#allocation11 + $0x30] sm:$0xff]  ;;  %v2786_v48 = vld [vmem:[#allocation2] sm:$0xff]  ;;  %v2787_v4 = vld [vmem:[#allocation2 + $0x18] sm:$0xff] }
 0x242   :  { %v1065_v58 = vmax.f32 %v1049_v52, 0.0  ;;  %v1066_v59 = vmax.f32 %v1050_v55, 0.0  ;;  %v1051_v60 = vmax.f32 %v1035_v17, 0.0  ;;  %v1052_v39 = vmax.f32 %v1036_v22, 0.0  ;;  %v2797_v52 = vld [vmem:[#allocation11 + $0x20] sm:$0xff]  ;;  %v2788_v55 = vld [vmem:[#allocation2 + $0x10] sm:$0xff] }
 0x243   :  { %v1063_v36 = vmax.f32 %v1047_v23, 0.0  ;;  %v1064_v9 = vmax.f32 %v1048_v24, 0.0  ;;  %v1009_v37 = vmul.f32 %v1000_v31, %v3590_v29  ;;  %v1010_v6 = vmul.f32 %v1000_v31, %v3594_v41  ;;  %v2796_v17 = vld [vmem:[#allocation11 + $0x18] sm:$0xff]  ;;  %v2789_v22 = vld [vmem:[#allocation2 + $0x8] sm:$0xff]  ;;  %v2795_v23 = vld [vmem:[#allocation11 + $0x10] sm:$0xff] }
 0x244   :  { %v3640_v53 = vpack.c.bf16 %v1066_v59, %v1065_v58  ;;  %v1067_v16 = vpack.c.bf16 %v1052_v39, %v1051_v60  ;;  %v1061_v61 = vmax.f32 %v1045_v25, 0.0  ;;  %v1007_v34 = vmul.f32 %v1000_v31, %v3582_v50  ;;  %v2790_v24 = vld [vmem:[#allocation2 + $0x20] sm:$0xff]  ;;  %v2794_v25 = vld [vmem:[#allocation11 + $0x8] sm:$0xff]  ;;  %v2792_v59 = vld [vmem:[#allocation2 + $0x38] sm:$0xff]  ;;  %v1212_v39 = vpop.permute.xlu2 %1211 }
 0x245   :  { %v3644_v11 = vpack.c.bf16 %v1064_v9, %v1063_v36  ;;  %v1008_v33 = vmul.f32 %v1000_v31, %v3586_v32  ;;  %v1062_v30 = vmax.f32 %v1046_v5, 0.0  ;;  %v1026_v28 = vmul.f32 %v3614_v3, %v1009_v37  ;;  %1518 = vmatpush.bf16.msrb.mxu1 %v2799_v62  ;;  %v2791_v5 = vld [vmem:[#allocation2 + $0x28] sm:$0xff]  ;;  %v2793_v58 = vld [vmem:[#allocation11] sm:$0xff]  ;;  %v1207_v36 = vpop.permute.xlu1 %1206 }
 0x246   :  { %1139 = vmatpush.bf16.msra.mxu3 %v3640_v53  ;;  %1428 = vmatmul.bf16.vlgmr.msrb.gmra.mxu0 %v1067_v16  ;;  %v1027_v63 = vmul.f32 %v3614_v3, %v1010_v6  ;;  %v1003_v42 = vmul.f32 %v1000_v31, %v3561_v56  ;;  %v1024_v29 = vmul.f32 %v3614_v3, %v1007_v34  ;;  %v1217_v34 = vpop.permute.xlu0 %1216 }
 0x247   :  { %v1025_v41 = vmul.f32 %v3614_v3, %v1008_v33  ;;  %v1004_v44 = vmul.f32 %v1000_v31, %v3570_v38  ;;  %v1005_v50 = vmul.f32 %v1000_v31, %v3564_v40  ;;  %v1043_v32 = vadd.f32 %v3617_v7, %v1026_v28 }
 0x248   :  { %v1044_v45 = vadd.f32 %v3617_v7, %v1027_v63  ;;  %v1020_v46 = vmul.f32 %v3614_v3, %v1003_v42  ;;  %v1006_v26 = vmul.f32 %v1000_v31, %v3578_v54  ;;  %v1072_v51 = vpack.c.bf16 %v1062_v30, %v1061_v61 }
 0x249   :  { %v1021_v47 = vmul.f32 %v3614_v3, %v1004_v44  ;;  %v1059_v56 = vmax.f32 %v1043_v32, 0.0  ;;  %v1041_v35 = vadd.f32 %v3617_v7, %v1024_v29  ;;  %v1042_v38 = vadd.f32 %v3617_v7, %v1025_v41 }
 0x24a   :  { %1140 = vmatpush.bf16.msra.mxu3 %v3644_v11  ;;  %v1060_v49 = vmax.f32 %v1044_v45, 0.0  ;;  %v1022_v40 = vmul.f32 %v3614_v3, %v1005_v50  ;;  %v1037_v43 = vadd.f32 %v3617_v7, %v1020_v46  ;;  %v1023_v54 = vmul.f32 %v3614_v3, %v1006_v26  ;;  %v2785_v3 = vld [vmem:[#allocation2 + $0x30] sm:$0xff] }
 0x24b   :  { %v1038_v8 = vadd.f32 %v3617_v7, %v1021_v47  ;;  %v1057_v31 = vmax.f32 %v1041_v35, 0.0  ;;  %v1058_v18 = vmax.f32 %v1042_v38, 0.0 }
 0x24c   :  { %v1071_v2 = vpack.c.bf16 %v1060_v49, %v1059_v56  ;;  %v1053_v14 = vmax.f32 %v1037_v43, 0.0  ;;  %v1039_v27 = vadd.f32 %v3617_v7, %v1022_v40  ;;  %v1040_v12 = vadd.f32 %v3617_v7, %v1023_v54  ;;  %v2798_v7 = vld [vmem:[#allocation11 + $0x28] sm:$0xff]  ;;  %v1227_v42 = vpop.permute.xlu2 %1226 }
 0x24d   :  { %v1054_v15 = vmax.f32 %v1038_v8, 0.0  ;;  %v1070_v13 = vpack.c.bf16 %v1058_v18, %v1057_v31  ;;  %1519 = vmatpush.bf16.msrb.mxu1 %v2798_v7  ;;  %v1222_v61 = vpop.permute.xlu1 %1221 }
 0x24e   :  { %1141 = vmatpush.bf16.msra.mxu3 %v1072_v51  ;;  %v1055_v57 = vmax.f32 %v1039_v27, 0.0  ;;  %v1056_v21 = vmax.f32 %v1040_v12, 0.0  ;;  %v1232_v29 = vpop.permute.xlu0 %1231 }
 0x24f   :  { %v1068_v10 = vpack.c.bf16 %v1054_v15, %v1053_v14 }
 0x250   :  { %v1069_v19 = vpack.c.bf16 %v1056_v21, %v1055_v57 }
 0x251   :  { %1520 = vmatpush.bf16.msrb.mxu1 %v2797_v52 }
 0x252   :  { %1142 = vmatpush.bf16.msra.mxu3 %v1071_v2 }
 0x254   :  { %v1242_v46 = vpop.permute.xlu2 %1241 }
 0x255   :  { %1521 = vmatpush.bf16.msrb.mxu1 %v2796_v17  ;;  %v1237_v26 = vpop.permute.xlu1 %1236 }
 0x256   :  { %1143 = vmatpush.bf16.msra.mxu3 %v1070_v13  ;;  %1433 = vmatmul.bf16.gmra.mxu0 %v1068_v10  ;;  %v1247_v40 = vpop.permute.xlu0 %1246 }
 0x259   :  { %1522 = vmatpush.bf16.msrb.mxu1 %v2795_v23 }
 0x25a   :  { %1144 = vmatpush.bf16.msra.mxu3 %v1069_v19 }
 0x25c   :  { %v1257_v18 = vpop.permute.xlu2 %1256 }
 0x25d   :  { %1523 = vmatpush.bf16.msrb.mxu1 %v2794_v25  ;;  %v1252_v38 = vpop.permute.xlu1 %1251 }
 0x25e   :  { %1145 = vmatpush.bf16.msra.mxu3 %v1068_v10  ;;  %v1262_v14 = vpop.permute.xlu0 %1261 }
 0x261   :  { %1524 = vmatpush.bf16.msrb.mxu1 %v2793_v58 }
 0x262   :  { %1146 = vmatpush.bf16.msra.mxu3 %v1067_v16 }
 0x264   :  { %v1272_v57 = vpop.permute.xlu2 %1271 }
 0x265   :  { %1147 = vmatmul.bf16.vlgmr.msra.gmra.mxu3 %v2785_v3  ;;  %v1267_v21 = vpop.permute.xlu1 %1266 }
 0x266   :  { %1438 = vmatmul.bf16.gmra.mxu0 %v1069_v19 }
 0x26d   :  { %v1282_v52 = vpop.permute.xlu1 %1281 }
 0x275   :  { %1152 = vmatmul.bf16.gmra.mxu3 %v2786_v48 }
 0x276   :  { %1443 = vmatmul.bf16.gmra.mxu0 %v1070_v13 }
 0x285   :  { %1157 = vmatmul.bf16.gmra.mxu3 %v2787_v4 }
 0x286   :  { %1448 = vmatmul.bf16.gmra.mxu0 %v1071_v2 }
 0x295   :  { %1162 = vmatmul.bf16.gmra.mxu3 %v2788_v55  ;;  %v1277_v55 = vpop.permute.xlu0 %1276 }
 0x296   :  { %1453 = vmatmul.bf16.gmra.mxu0 %v1072_v51 }
 0x2a5   :  { %1167 = vmatmul.bf16.gmra.mxu3 %v2789_v22 }
 0x2a6   :  { %1458 = vmatmul.bf16.gmra.mxu0 %v3644_v11 }
 0x2b5   :  { %1172 = vmatmul.bf16.gmra.mxu3 %v2790_v24 }
 0x2b6   :  { %1463 = vmatmul.bf16.gmra.mxu0 %v3640_v53 }
 0x2c3   :  { %v1429_v48 = vpop.f32.mrf.mxu0 }
 0x2c5   :  { %1177 = vmatmul.bf16.gmra.mxu3 %v2791_v5 }
 0x2cb   :  { %v1431_v4 = vpop.f32.mrf.mxu0 }
 0x2d3   :  { %v1434_v25 = vpop.f32.mrf.mxu0 }
 0x2d5   :  { %1182 = vmatmul.bf16.gmra.mxu3 %v2792_v59 }
 0x2db   :  { %v1436_v5 = vpop.f32.mrf.mxu0 }
 0x2e8   :  { %v1148_v60 = vpop.f32.mrf.mxu3 }
 0x2e9   :  { %v1284_v16 = vmul.f32 %v1207_v36, %v1148_v60  ;;  %v3673_v60 = vperm.slane %v3225_v0, 3 }
 0x2f0   :  { %v1150_v9 = vpop.f32.mrf.mxu3 }
 0x2f1   :  { %v1285_v37 = vmul.f32 %v1212_v39, %v1150_v9  ;;  %v1439_v9 = vpop.f32.mrf.mxu0 }
 0x2f3   :  { %v1332_v6 = vpack.c.bf16 %v1285_v37, %v1284_v16 }
 0x2f5   :  { %1525 = vmatmul.bf16.vlgmr.msrb.gmra.mxu1 %v1332_v6 }
 0x2f8   :  { %v1153_v11 = vpop.f32.mrf.mxu3 }
 0x2f9   :  { %v1286_v53 = vmul.f32 %v1217_v34, %v1153_v11 }
 0x300   :  { %v1155_v33 = vpop.f32.mrf.mxu3 }
 0x301   :  { %v1287_v30 = vmul.f32 %v1222_v61, %v1155_v33  ;;  %v1441_v33 = vpop.f32.mrf.mxu0 }
 0x303   :  { %v1333_v28 = vpack.c.bf16 %v1287_v30, %v1286_v53 }
 0x305   :  { %1530 = vmatmul.bf16.gmra.mxu1 %v1333_v28 }
 0x308   :  { %v1158_v63 = vpop.f32.mrf.mxu3 }
 0x309   :  { %v1288_v44 = vmul.f32 %v1227_v42, %v1158_v63 }
 0x310   :  { %v1160_v41 = vpop.f32.mrf.mxu3 }
 0x311   :  { %v1289_v50 = vmul.f32 %v1232_v29, %v1160_v41  ;;  %v1444_v41 = vpop.f32.mrf.mxu0 }
 0x313   :  { %v1334_v32 = vpack.c.bf16 %v1289_v50, %v1288_v44 }
 0x315   :  { %1535 = vmatmul.bf16.gmra.mxu1 %v1334_v32 }
 0x318   :  { %v1163_v45 = vpop.f32.mrf.mxu3 }
 0x319   :  { %v1290_v56 = vmul.f32 %v1237_v26, %v1163_v45 }
 0x320   :  { %v1165_v47 = vpop.f32.mrf.mxu3 }
 0x321   :  { %v1291_v49 = vmul.f32 %v1242_v46, %v1165_v47  ;;  %v1446_v47 = vpop.f32.mrf.mxu0 }
 0x323   :  { %v1335_v51 = vpack.c.bf16 %v1291_v49, %v1290_v56 }
 0x325   :  { %1540 = vmatmul.bf16.gmra.mxu1 %v1335_v51 }
 0x328   :  { %v1168_v35 = vpop.f32.mrf.mxu3 }
 0x329   :  { %v1292_v43 = vmul.f32 %v1247_v40, %v1168_v35  ;;  %v1449_v51 = vpop.f32.mrf.mxu0  ;;  %v2816_v40 = vld [vmem:[#allocation14 + $0x38] sm:$0xff] }
 0x32a   :  { %1841 = vmatpush.bf16.msrb.mxu2 %v2816_v40 }
 0x330   :  { %v1170_v2 = vpop.f32.mrf.mxu3 }
 0x331   :  { %v1293_v8 = vmul.f32 %v1252_v38, %v1170_v2  ;;  %v1451_v38 = vpop.f32.mrf.mxu0 }
 0x333   :  { %v1336_v54 = vpack.c.bf16 %v1293_v8, %v1292_v43 }
 0x335   :  { %1545 = vmatmul.bf16.gmra.mxu1 %v1336_v54  ;;  %v2815_v54 = vld [vmem:[#allocation14 + $0x30] sm:$0xff] }
 0x336   :  { %1842 = vmatpush.bf16.msrb.mxu2 %v2815_v54 }
 0x338   :  { %v1173_v31 = vpop.f32.mrf.mxu3 }
 0x339   :  { %v1294_v27 = vmul.f32 %v1257_v18, %v1173_v31  ;;  %v1454_v43 = vpop.f32.mrf.mxu0 }
 0x340   :  { %v1175_v15 = vpop.f32.mrf.mxu3 }
 0x341   :  { %v1295_v12 = vmul.f32 %v1262_v14, %v1175_v15  ;;  %v1456_v31 = vpop.f32.mrf.mxu0 }
 0x343   :  { %v1337_v13 = vpack.c.bf16 %v1295_v12, %v1294_v27 }
 0x345   :  { %1550 = vmatmul.bf16.gmra.mxu1 %v1337_v13 }
 0x348   :  { %v1178_v10 = vpop.f32.mrf.mxu3 }
 0x349   :  { %v1296_v19 = vmul.f32 %v1267_v21, %v1178_v10  ;;  %v1459_v15 = vpop.f32.mrf.mxu0 }
 0x350   :  { %v1180_v20 = vpop.f32.mrf.mxu3 }
 0x351   :  { %v1297_v3 = vmul.f32 %v1272_v57, %v1180_v20  ;;  %v1461_v21 = vpop.f32.mrf.mxu0 }
 0x353   :  { %v1338_v62 = vpack.c.bf16 %v1297_v3, %v1296_v19 }
 0x355   :  { %1555 = vmatmul.bf16.gmra.mxu1 %v1338_v62 }
 0x358   :  { %v1183_v7 = vpop.f32.mrf.mxu3 }
 0x359   :  { %v1298_v22 = vmul.f32 %v1277_v55, %v1183_v7 }
 0x360   :  { %v1185_v17 = vpop.f32.mrf.mxu3 }
 0x361   :  { %v1299_v23 = vmul.f32 %v1282_v52, %v1185_v17 }
 0x363   :  { %v1339_v24 = vpack.c.bf16 %v1299_v23, %v1298_v22 }
 0x365   :  { %1560 = vmatmul.bf16.gmra.mxu1 %v1339_v24 }
 0x372   :  { %v1526_v58 = vpop.f32.mrf.mxu1 }
 0x373   :  { %v1527_v59 = vadd.f32 %v1526_v58, %v1429_v48 }
 0x375   :  { %v3676_v16 = vadd.f32 %v3673_v60, %v1527_v59 }
 0x37a   :  { %v1528_v39 = vpop.f32.mrf.mxu1 }
 0x37b   :  { %v1529_v36 = vadd.f32 %v1528_v39, %v1431_v4  ;;  %v1464_v39 = vpop.f32.mrf.mxu0 }
 0x37d   :  { %v3679_v37 = vadd.f32 %v3673_v60, %v1529_v36 }
 0x37f   :  { %v1599_v6 = vadd.f32 %v3679_v37, %v3676_v16 }
 0x382   :  { %v1531_v11 = vpop.f32.mrf.mxu1 }
 0x383   :  { %v1532_v61 = vadd.f32 %v1531_v11, %v1434_v25 }
 0x385   :  { %v3684_v34 = vadd.f32 %v3673_v60, %v1532_v61 }
 0x387   :  { %v1585_v53 = vmul.f32 0.0, %v3684_v34 }
 0x389   :  { %v1600_v30 = vadd.f32 %v1599_v6, %v1585_v53 }
 0x38a   :  { %v1533_v28 = vpop.f32.mrf.mxu1 }
 0x38b   :  { %v1534_v63 = vadd.f32 %v1533_v28, %v1436_v5 }
 0x38d   :  { %v3688_v42 = vadd.f32 %v3673_v60, %v1534_v63 }
 0x38f   :  { %v1586_v29 = vmul.f32 0.0, %v3688_v42 }
 0x391   :  { %v1601_v44 = vadd.f32 %v1600_v30, %v1586_v29 }
 0x392   :  { %v1536_v50 = vpop.f32.mrf.mxu1 }
 0x393   :  { %v1537_v32 = vadd.f32 %v1536_v50, %v1439_v9 }
 0x395   :  { %v3692_v45 = vadd.f32 %v3673_v60, %v1537_v32 }
 0x397   :  { %v1587_v46 = vmul.f32 0.0, %v3692_v45 }
 0x399   :  { %v1602_v26 = vadd.f32 %v1601_v44, %v1587_v46 }
 0x39a   :  { %v1538_v56 = vpop.f32.mrf.mxu1 }
 0x39b   :  { %v1539_v27 = vadd.f32 %v1538_v56, %v1441_v33 }
 0x39d   :  { %v3696_v10 = vadd.f32 %v3673_v60, %v1539_v27 }
 0x39f   :  { %v1588_v3 = vmul.f32 0.0, %v3696_v10 }
 0x3a1   :  { %v1603_v17 = vadd.f32 %v1602_v26, %v1588_v3 }
 0x3a2   :  { %v1541_v49 = vpop.f32.mrf.mxu1 }
 0x3a3   :  { %v1542_v13 = vadd.f32 %v1541_v49, %v1444_v41 }
 0x3a5   :  { %v3699_v20 = vadd.f32 %v3673_v60, %v1542_v13 }
 0x3a7   :  { %v1589_v4 = vmul.f32 0.0, %v3699_v20 }
 0x3a9   :  { %v1604_v25 = vadd.f32 %v1603_v17, %v1589_v4 }
 0x3aa   :  { %v1543_v35 = vpop.f32.mrf.mxu1 }
 0x3ab   :  { %v1544_v57 = vadd.f32 %v1543_v35, %v1446_v47  ;;  %v1466_v47 = vpop.f32.mrf.mxu0 }
 0x3ad   :  { %v3703_v62 = vadd.f32 %v3673_v60, %v1544_v57 }
 0x3af   :  { %v1590_v22 = vmul.f32 0.0, %v3703_v62 }
 0x3b1   :  { %v1605_v36 = vadd.f32 %v1604_v25, %v1590_v22 }
 0x3b2   :  { %v1546_v2 = vpop.f32.mrf.mxu1 }
 0x3b3   :  { %v1547_v19 = vadd.f32 %v1546_v2, %v1449_v51 }
 0x3b5   :  { %v3707_v52 = vadd.f32 %v3673_v60, %v1547_v19 }
 0x3b7   :  { %v1591_v5 = vmul.f32 0.0, %v3707_v52 }
 0x3b9   :  { %v1606_v33 = vadd.f32 %v1605_v36, %v1591_v5 }
 0x3ba   :  { %v1548_v8 = vpop.f32.mrf.mxu1 }
 0x3bb   :  { %v1549_v48 = vadd.f32 %v1548_v8, %v1451_v38 }
 0x3bd   :  { %v3711_v23 = vadd.f32 %v3673_v60, %v1549_v48 }
 0x3bf   :  { %v1592_v9 = vmul.f32 0.0, %v3711_v23 }
 0x3c1   :  { %v1607_v63 = vadd.f32 %v1606_v33, %v1592_v9 }
 0x3c2   :  { %v1551_v18 = vpop.f32.mrf.mxu1 }
 0x3c3   :  { %v1552_v55 = vadd.f32 %v1551_v18, %v1454_v43 }
 0x3c5   :  { %v3715_v58 = vadd.f32 %v3673_v60, %v1552_v55 }
 0x3c7   :  { %v1593_v53 = vmul.f32 0.0, %v3715_v58 }
 0x3c9   :  { %v1608_v44 = vadd.f32 %v1607_v63, %v1593_v53 }
 0x3ca   :  { %v1553_v14 = vpop.f32.mrf.mxu1 }
 0x3cb   :  { %v1554_v24 = vadd.f32 %v1553_v14, %v1456_v31 }
 0x3cd   :  { %v1578_v6 = vadd.f32 %v3673_v60, %v1554_v24 }
 0x3cf   :  { %v1594_v29 = vmul.f32 0.0, %v1578_v6 }
 0x3d1   :  { %v1609_v46 = vadd.f32 %v1608_v44, %v1594_v29 }
 0x3d2   :  { %v1556_v12 = vpop.f32.mrf.mxu1 }
 0x3d3   :  { %v1557_v59 = vadd.f32 %v1556_v12, %v1459_v15 }
 0x3d5   :  { %v1579_v30 = vadd.f32 %v3673_v60, %v1557_v59 }
 0x3d7   :  { %v1595_v50 = vmul.f32 0.0, %v1579_v30 }
 0x3d9   :  { %v1610_v49 = vadd.f32 %v1609_v46, %v1595_v50 }
 0x3da   :  { %v1558_v7 = vpop.f32.mrf.mxu1 }
 0x3db   :  { %v1559_v11 = vadd.f32 %v1558_v7, %v1461_v21 }
 0x3dd   :  { %v1580_v41 = vadd.f32 %v3673_v60, %v1559_v11 }
 0x3df   :  { %v1596_v26 = vmul.f32 0.0, %v1580_v41 }
 0x3e1   :  { %v1611_v38 = vadd.f32 %v1610_v49, %v1596_v26 }
 0x3e2   :  { %v1561_v61 = vpop.f32.mrf.mxu1 }
 0x3e3   :  { %v1562_v28 = vadd.f32 %v1561_v61, %v1464_v39 }
 0x3e5   :  { %v1581_v32 = vadd.f32 %v3673_v60, %v1562_v28 }
 0x3e7   :  { %v1597_v51 = vmul.f32 0.0, %v1581_v32 }
 0x3e9   :  { %v1612_v2 = vadd.f32 %v1611_v38, %v1597_v51 }
 0x3ea   :  { %v1563_v56 = vpop.f32.mrf.mxu1 }
 0x3eb   :  { %v1564_v35 = vadd.f32 %v1563_v56, %v1466_v47 }
 0x3ed   :  { %v1582_v40 = vadd.f32 %v3673_v60, %v1564_v35 }
 0x3ef   :  { %v1598_v43 = vmul.f32 0.0, %v1582_v40 }
 0x3f1   :  { %v1613_v8 = vadd.f32 %v1612_v2, %v1598_v43 }
 0x3f3   :  { %v1614_v54 = vrot.slane %v1613_v8, 4 }
 0x3f5   :  { %v1615_v31 = vadd.f32 %v1614_v54, %v1613_v8 }
 0x3f7   :  { %v1616_v18 = vrot.slane %v1615_v31, 2 }
 0x3f9   :  { %v1617_v14 = vadd.f32 %v1616_v18, %v1615_v31 }
 0x3fb   :  { %v1618_v15 = vrot.slane %v1617_v14, 1 }
 0x3fd   :  { %v1619_v27 = vadd.f32 %v1618_v15, %v1617_v14  ;;  %v2814_v14 = vld [vmem:[#allocation14 + $0x28] sm:$0xff] }
 0x3fe   :  { %1843 = vmatpush.bf16.msrb.mxu2 %v2814_v14 }
 0x3ff   :  { %v1620_v12 = vmul.f32 0.0625, %v1619_v27 }
 0x401   :  { %v3725_v13 = vsub.f32 %v3676_v16, %v1620_v12  ;;  %v3728_v57 = vsub.f32 %v3679_v37, %v1620_v12  ;;  %v3731_v21 = vsub.f32 %v3684_v34, %v1620_v12  ;;  %v3734_v60 = vsub.f32 %v3688_v42, %v1620_v12 }
 0x402   :  { %v3737_v19 = vsub.f32 %v3692_v45, %v1620_v12  ;;  %v3745_v37 = vsub.f32 %v3696_v10, %v1620_v12  ;;  %v3749_v42 = vsub.f32 %v3699_v20, %v1620_v12  ;;  %v3753_v55 = vsub.f32 %v3703_v62, %v1620_v12 }
 0x403   :  { %v1639_v3 = vmul.f32 0.0, %v3731_v21  ;;  %v1653_v48 = vmul.f32 %v3725_v13, %v3725_v13  ;;  %v1654_v16 = vmul.f32 %v3728_v57, %v3728_v57  ;;  %v1640_v34 = vmul.f32 0.0, %v3734_v60 }
 0x404   :  { %v1641_v45 = vmul.f32 0.0, %v3737_v19  ;;  %v1642_v17 = vmul.f32 0.0, %v3745_v37  ;;  %v3757_v25 = vsub.f32 %v3707_v52, %v1620_v12  ;;  %v1643_v10 = vmul.f32 0.0, %v3749_v42 }
 0x405   :  { %v1655_v7 = vmul.f32 %v1639_v3, %v1639_v3  ;;  %v1669_v4 = vadd.f32 %v1654_v16, %v1653_v48  ;;  %v1656_v22 = vmul.f32 %v1640_v34, %v1640_v34  ;;  %v3761_v20 = vsub.f32 %v3711_v23, %v1620_v12  ;;  %v2813_v48 = vld [vmem:[#allocation14 + $0x20] sm:$0xff] }
 0x406   :  { %v1657_v5 = vmul.f32 %v1641_v45, %v1641_v45  ;;  %v1644_v39 = vmul.f32 0.0, %v3753_v55  ;;  %v1658_v36 = vmul.f32 %v1642_v17, %v1642_v17  ;;  %v3765_v62 = vsub.f32 %v3715_v58, %v1620_v12  ;;  %1844 = vmatpush.bf16.msrb.mxu2 %v2813_v48  ;;  %v2810_v17 = vld [vmem:[#allocation14 + $0x8] sm:$0xff] }
 0x407   :  { %v1670_v24 = vadd.f32 %v1669_v4, %v1655_v7  ;;  %v1645_v11 = vmul.f32 0.0, %v3757_v25  ;;  %v1659_v61 = vmul.f32 %v1643_v10, %v1643_v10  ;;  %v3768_v52 = vsub.f32 %v1578_v6, %v1620_v12  ;;  %v2811_v7 = vld [vmem:[#allocation14 + $0x10] sm:$0xff]  ;;  %v2809_v10 = vld [vmem:[#allocation14] sm:$0xff] }
 0x408   :  { %v1646_v53 = vmul.f32 0.0, %v3761_v20  ;;  %v1660_v28 = vmul.f32 %v1644_v39, %v1644_v39  ;;  %v3771_v29 = vsub.f32 %v1579_v30, %v1620_v12  ;;  %v1647_v23 = vmul.f32 0.0, %v3765_v62 }
 0x409   :  { %v1671_v59 = vadd.f32 %v1670_v24, %v1656_v22  ;;  %v1661_v44 = vmul.f32 %v1645_v11, %v1645_v11  ;;  %v3774_v46 = vsub.f32 %v1580_v41, %v1620_v12  ;;  %v1648_v58 = vmul.f32 0.0, %v3768_v52 }
 0x40a   :  { %v1662_v26 = vmul.f32 %v1646_v53, %v1646_v53  ;;  %v3777_v56 = vsub.f32 %v1581_v32, %v1620_v12  ;;  %v1649_v6 = vmul.f32 0.0, %v3771_v29  ;;  %v1663_v49 = vmul.f32 %v1647_v23, %v1647_v23 }
 0x40b   :  { %v1672_v9 = vadd.f32 %v1671_v59, %v1657_v5  ;;  %v1636_v35 = vsub.f32 %v1582_v40, %v1620_v12  ;;  %v1650_v30 = vmul.f32 0.0, %v3774_v46  ;;  %v1664_v38 = vmul.f32 %v1648_v58, %v1648_v58  ;;  %v2812_v12 = vld [vmem:[#allocation14 + $0x18] sm:$0xff] }
 0x40c   :  { %v1651_v43 = vmul.f32 0.0, %v3777_v56  ;;  %v1665_v8 = vmul.f32 %v1649_v6, %v1649_v6  ;;  %1845 = vmatpush.bf16.msrb.mxu2 %v2812_v12  ;;  %v3783_v53 = vperm.slane %v3225_v0, 4 }
 0x40d   :  { %v1673_v33 = vadd.f32 %v1672_v9, %v1658_v36  ;;  %v1652_v54 = vmul.f32 0.0, %v1636_v35  ;;  %v1666_v31 = vmul.f32 %v1650_v30, %v1650_v30 }
 0x40e   :  { %v1667_v15 = vmul.f32 %v1651_v43, %v1651_v43 }
 0x40f   :  { %v1674_v63 = vadd.f32 %v1673_v33, %v1659_v61  ;;  %v1668_v27 = vmul.f32 %v1652_v54, %v1652_v54 }
 0x410   :  { %1846 = vmatpush.bf16.msrb.mxu2 %v2811_v7 }
 0x411   :  { %v1675_v50 = vadd.f32 %v1674_v63, %v1660_v28 }
 0x413   :  { %v1676_v47 = vadd.f32 %v1675_v50, %v1661_v44  ;;  %v3792_v44 = vperm.slane %v3225_v0, 5 }
 0x414   :  { %1847 = vmatpush.bf16.msrb.mxu2 %v2810_v17 }
 0x415   :  { %v1677_v51 = vadd.f32 %v1676_v47, %v1662_v26 }
 0x417   :  { %v1678_v2 = vadd.f32 %v1677_v51, %v1663_v49 }
 0x418   :  { %1848 = vmatpush.bf16.msrb.mxu2 %v2809_v10 }
 0x419   :  { %v1679_v41 = vadd.f32 %v1678_v2, %v1664_v38 }
 0x41b   :  { %v1680_v18 = vadd.f32 %v1679_v41, %v1665_v8 }
 0x41d   :  { %v1681_v32 = vadd.f32 %v1680_v18, %v1666_v31 }
 0x41f   :  { %v1682_v3 = vadd.f32 %v1681_v32, %v1667_v15 }
 0x421   :  { %v1683_v16 = vadd.f32 %v1682_v3, %v1668_v27 }
 0x423   :  { %v1684_v40 = vrot.slane %v1683_v16, 4 }
 0x425   :  { %v1685_v34 = vadd.f32 %v1684_v40, %v1683_v16 }
 0x427   :  { %v1686_v45 = vrot.slane %v1685_v34, 2 }
 0x429   :  { %v1687_v4 = vadd.f32 %v1686_v45, %v1685_v34 }
 0x42b   :  { %v1688_v22 = vrot.slane %v1687_v4, 1 }
 0x42d   :  { %v1689_v24 = vadd.f32 %v1688_v22, %v1687_v4 }
 0x42f   :  { %v1690_v5 = vmul.f32 0.0625, %v1689_v24 }
 0x431   :  { %v1691_v59 = vadd.f32 1e-05, %v1690_v5 }
 0x433   :  { %2843 = vrsqrt.f32 %v1691_v59  ;;  %vm1698_vm4 = vweird.f32 %v1691_v59 }
 0x439   :  { %v2844_v39 = vpop.eup %2843 }
 0x43a   :  { %v1693_v36 = vmul.f32 %v2844_v39, %v1691_v59  ;;  %vm1699_vm3 = vweird.f32 %v2844_v39 }
 0x43b   :  { %vm1700_vm5 = vmor %vm1698_vm4, %vm1699_vm3 }
 0x43c   :  { %v1694_v9 = vmul.f32 %v2844_v39, %v1693_v36 }
 0x43e   :  { %v1695_v11 = vmul.f32 0.5, %v1694_v9 }
 0x440   :  { %v1696_v61 = vsub.f32 1.5, %v1695_v11 }
 0x442   :  { %v1697_v33 = vmul.f32 %v2844_v39, %v1696_v61 }
 0x444   :  { %v3785_v28 = vsel %vm1700_vm5, %v2844_v39, %v1697_v33 }
 0x445   :  { %v1702_v63 = vmul.f32 %v3785_v28, %v3725_v13  ;;  %v1703_v23 = vmul.f32 %v3785_v28, %v3728_v57  ;;  %v1704_v26 = vmul.f32 %v3785_v28, %v3731_v21  ;;  %v1705_v13 = vmul.f32 %v3785_v28, %v3734_v60 }
 0x446   :  { %v1717_v30 = vmul.f32 %v3785_v28, %v1636_v35  ;;  %v1710_v2 = vmul.f32 %v3785_v28, %v3757_v25  ;;  %v1711_v21 = vmul.f32 %v3785_v28, %v3761_v20  ;;  %v1712_v8 = vmul.f32 %v3785_v28, %v3765_v62 }
 0x447   :  { %v1719_v50 = vmul.f32 %v3783_v53, %v1702_v63  ;;  %v1720_v58 = vmul.f32 %v3783_v53, %v1703_v23  ;;  %v1721_v57 = vmul.f32 %v3783_v53, %v1704_v26  ;;  %v1722_v43 = vmul.f32 %v3783_v53, %v1705_v13 }
 0x448   :  { %v1713_v60 = vmul.f32 %v3785_v28, %v3768_v52  ;;  %v1727_v35 = vmul.f32 %v3783_v53, %v1710_v2  ;;  %v1728_v54 = vmul.f32 %v3783_v53, %v1711_v21  ;;  %v1714_v25 = vmul.f32 %v3785_v28, %v3771_v29 }
 0x449   :  { %v1736_v47 = vadd.f32 %v3792_v44, %v1719_v50  ;;  %v1737_v6 = vadd.f32 %v3792_v44, %v1720_v58  ;;  %v1738_v41 = vadd.f32 %v3792_v44, %v1721_v57  ;;  %v1729_v20 = vmul.f32 %v3783_v53, %v1712_v8 }
 0x44a   :  { %v1730_v31 = vmul.f32 %v3783_v53, %v1713_v60  ;;  %v1715_v62 = vmul.f32 %v3785_v28, %v3774_v46  ;;  %v1716_v52 = vmul.f32 %v3785_v28, %v3777_v56  ;;  %v1744_v18 = vadd.f32 %v3792_v44, %v1727_v35 }
 0x44b   :  { %v1752_v49 = vmax.f32 %v1736_v47, 0.0  ;;  %v1753_v51 = vmax.f32 %v1737_v6, 0.0  ;;  %v1745_v14 = vadd.f32 %v3792_v44, %v1728_v54  ;;  %v1731_v15 = vmul.f32 %v3783_v53, %v1714_v25 }
 0x44c   :  { %v1734_v32 = vmul.f32 %v3783_v53, %v1717_v30  ;;  %v1746_v29 = vadd.f32 %v3792_v44, %v1729_v20  ;;  %v1747_v27 = vadd.f32 %v3792_v44, %v1730_v31  ;;  %v1732_v3 = vmul.f32 %v3783_v53, %v1715_v62 }
 0x44d   :  { %v1768_v38 = vpack.c.bf16 %v1753_v51, %v1752_v49  ;;  %v1733_v48 = vmul.f32 %v3783_v53, %v1716_v52  ;;  %v1760_v46 = vmax.f32 %v1744_v18, 0.0  ;;  %v1761_v16 = vmax.f32 %v1745_v14, 0.0 }
 0x44e   :  { %v1748_v56 = vadd.f32 %v3792_v44, %v1731_v15  ;;  %v1751_v40 = vadd.f32 %v3792_v44, %v1734_v32  ;;  %v1762_v12 = vmax.f32 %v1746_v29, 0.0  ;;  %v1763_v34 = vmax.f32 %v1747_v27, 0.0 }
 0x44f   :  { %1849 = vmatmul.bf16.vlgmr.msrb.gmra.mxu2 %v1768_v38  ;;  %v1749_v7 = vadd.f32 %v3792_v44, %v1732_v3  ;;  %v1750_v45 = vadd.f32 %v3792_v44, %v1733_v48  ;;  %v1739_v4 = vadd.f32 %v3792_v44, %v1722_v43  ;;  %v1772_v17 = vpack.c.bf16 %v1761_v16, %v1760_v46 }
 0x450   :  { %v1764_v22 = vmax.f32 %v1748_v56, 0.0  ;;  %v1767_v24 = vmax.f32 %v1751_v40, 0.0  ;;  %v1773_v10 = vpack.c.bf16 %v1763_v34, %v1762_v12  ;;  %v1754_v9 = vmax.f32 %v1738_v41, 0.0  ;;  %v2824_v56 = vld [vmem:[#allocation15 + $0x38] sm:$0xff]  ;;  %v2823_v34 = vld [vmem:[#allocation15 + $0x30] sm:$0xff] }
 0x451   :  { %v1765_v5 = vmax.f32 %v1749_v7, 0.0  ;;  %v1766_v59 = vmax.f32 %v1750_v45, 0.0  ;;  %v1755_v11 = vmax.f32 %v1739_v4, 0.0  ;;  %v1706_v33 = vmul.f32 %v3785_v28, %v3737_v19  ;;  %2148 = vmatpush.bf16.msrb.mxu3 %v2824_v56 }
 0x452   :  { %v1707_v63 = vmul.f32 %v3785_v28, %v3745_v37  ;;  %v1708_v49 = vmul.f32 %v3785_v28, %v3749_v42  ;;  %v1709_v19 = vmul.f32 %v3785_v28, %v3753_v55  ;;  %v3854_v55 = vperm.slane %v3225_v0, 6 }
 0x453   :  { %v1774_v39 = vpack.c.bf16 %v1765_v5, %v1764_v22  ;;  %v1775_v36 = vpack.c.bf16 %v1767_v24, %v1766_v59  ;;  %v1769_v61 = vpack.c.bf16 %v1755_v11, %v1754_v9  ;;  %v1723_v23 = vmul.f32 %v3783_v53, %v1706_v33 }
 0x454   :  { %v1724_v50 = vmul.f32 %v3783_v53, %v1707_v63  ;;  %v1725_v37 = vmul.f32 %v3783_v53, %v1708_v49  ;;  %v1726_v51 = vmul.f32 %v3783_v53, %v1709_v19 }
 0x455   :  { %v1740_v58 = vadd.f32 %v3792_v44, %v1723_v23  ;;  %2149 = vmatpush.bf16.msrb.mxu3 %v2823_v34 }
 0x456   :  { %v1741_v26 = vadd.f32 %v3792_v44, %v1724_v50  ;;  %v1742_v57 = vadd.f32 %v3792_v44, %v1725_v37  ;;  %v1743_v30 = vadd.f32 %v3792_v44, %v1726_v51 }
 0x457   :  { %v1756_v47 = vmax.f32 %v1740_v58, 0.0 }
 0x458   :  { %v1757_v6 = vmax.f32 %v1741_v26, 0.0  ;;  %v1758_v38 = vmax.f32 %v1742_v57, 0.0  ;;  %v1759_v2 = vmax.f32 %v1743_v30, 0.0 }
 0x45a   :  { %v1770_v13 = vpack.c.bf16 %v1757_v6, %v1756_v47  ;;  %v1771_v21 = vpack.c.bf16 %v1759_v2, %v1758_v38 }
 0x45f   :  { %1854 = vmatmul.bf16.gmra.mxu2 %v1769_v61 }
 0x46f   :  { %1859 = vmatmul.bf16.gmra.mxu2 %v1770_v13 }
 0x47f   :  { %1864 = vmatmul.bf16.gmra.mxu2 %v1771_v21 }
 0x48f   :  { %1869 = vmatmul.bf16.gmra.mxu2 %v1772_v17 }
 0x49f   :  { %1874 = vmatmul.bf16.gmra.mxu2 %v1773_v10 }
 0x4af   :  { %1879 = vmatmul.bf16.gmra.mxu2 %v1774_v39 }
 0x4bf   :  { %1884 = vmatmul.bf16.gmra.mxu2 %v1775_v36 }
 0x4d2   :  { %v1850_v42 = vpop.f32.mrf.mxu2 }
 0x4d3   :  { %v3857_v28 = vadd.f32 %v1850_v42, %v3854_v55 }
 0x4d5   :  { %v1890_v44 = vmax.f32 %v3857_v28, 0.0 }
 0x4da   :  { %v1852_v53 = vpop.f32.mrf.mxu2 }
 0x4db   :  { %v3860_v43 = vadd.f32 %v1852_v53, %v3854_v55 }
 0x4dd   :  { %v1891_v8 = vmax.f32 %v3860_v43, 0.0 }
 0x4df   :  { %v1922_v60 = vadd.f32 %v1891_v8, %v1890_v44 }
 0x4e2   :  { %v1855_v41 = vpop.f32.mrf.mxu2 }
 0x4e3   :  { %v3869_v35 = vadd.f32 %v1855_v41, %v3854_v55 }
 0x4e5   :  { %v1892_v54 = vmax.f32 %v3869_v35, 0.0 }
 0x4e7   :  { %v1908_v25 = vmul.f32 0.0, %v1892_v54 }
 0x4e9   :  { %v1923_v20 = vadd.f32 %v1922_v60, %v1908_v25 }
 0x4ea   :  { %v1857_v31 = vpop.f32.mrf.mxu2 }
 0x4eb   :  { %v3875_v62 = vadd.f32 %v1857_v31, %v3854_v55 }
 0x4ed   :  { %v1893_v52 = vmax.f32 %v3875_v62, 0.0 }
 0x4ef   :  { %v1909_v18 = vmul.f32 0.0, %v1893_v52 }
 0x4f1   :  { %v1924_v14 = vadd.f32 %v1923_v20, %v1909_v18 }
 0x4f2   :  { %v1860_v15 = vpop.f32.mrf.mxu2 }
 0x4f3   :  { %v3881_v32 = vadd.f32 %v1860_v15, %v3854_v55 }
 0x4f5   :  { %v1894_v29 = vmax.f32 %v3881_v32, 0.0 }
 0x4f7   :  { %v1910_v27 = vmul.f32 0.0, %v1894_v29 }
 0x4f9   :  { %v1925_v3 = vadd.f32 %v1924_v14, %v1910_v27 }
 0x4fa   :  { %v1862_v48 = vpop.f32.mrf.mxu2 }
 0x4fb   :  { %v3887_v4 = vadd.f32 %v1862_v48, %v3854_v55 }
 0x4fd   :  { %v1895_v24 = vmax.f32 %v3887_v4, 0.0 }
 0x4ff   :  { %v1911_v39 = vmul.f32 0.0, %v1895_v24 }
 0x501   :  { %v1926_v23 = vadd.f32 %v1925_v3, %v1911_v39 }
 0x502   :  { %v1865_v46 = vpop.f32.mrf.mxu2 }
 0x503   :  { %v3890_v22 = vadd.f32 %v1865_v46, %v3854_v55 }
 0x505   :  { %v1896_v5 = vmax.f32 %v3890_v22, 0.0 }
 0x507   :  { %v1912_v61 = vmul.f32 0.0, %v1896_v5 }
 0x509   :  { %v1927_v47 = vadd.f32 %v1926_v23, %v1912_v61 }
 0x50a   :  { %v1867_v16 = vpop.f32.mrf.mxu2 }
 0x50b   :  { %v3894_v10 = vadd.f32 %v1867_v16, %v3854_v55 }
 0x50d   :  { %v1897_v36 = vmax.f32 %v3894_v10, 0.0 }
 0x50f   :  { %v1913_v50 = vmul.f32 0.0, %v1897_v36 }
 0x511   :  { %v1928_v19 = vadd.f32 %v1927_v47, %v1913_v50 }
 0x512   :  { %v1870_v40 = vpop.f32.mrf.mxu2 }
 0x513   :  { %v3898_v59 = vadd.f32 %v1870_v40, %v3854_v55 }
 0x515   :  { %v1898_v33 = vmax.f32 %v3898_v59, 0.0 }
 0x517   :  { %v1914_v6 = vmul.f32 0.0, %v1898_v33 }
 0x519   :  { %v1929_v38 = vadd.f32 %v1928_v19, %v1914_v6 }
 0x51a   :  { %v1872_v12 = vpop.f32.mrf.mxu2 }
 0x51b   :  { %v3902_v9 = vadd.f32 %v1872_v12, %v3854_v55 }
 0x51d   :  { %v1899_v58 = vmax.f32 %v3902_v9, 0.0 }
 0x51f   :  { %v1915_v37 = vmul.f32 0.0, %v1899_v58 }
 0x521   :  { %v1930_v53 = vadd.f32 %v1929_v38, %v1915_v37 }
 0x522   :  { %v1875_v7 = vpop.f32.mrf.mxu2 }
 0x523   :  { %v3906_v63 = vadd.f32 %v1875_v7, %v3854_v55 }
 0x525   :  { %v1900_v13 = vmax.f32 %v3906_v63, 0.0 }
 0x527   :  { %v1916_v2 = vmul.f32 0.0, %v1900_v13 }
 0x529   :  { %v1931_v25 = vadd.f32 %v1930_v53, %v1916_v2 }
 0x52a   :  { %v1877_v45 = vpop.f32.mrf.mxu2 }
 0x52b   :  { %v3910_v26 = vadd.f32 %v1877_v45, %v3854_v55 }
 0x52d   :  { %v1901_v51 = vmax.f32 %v3910_v26, 0.0 }
 0x52f   :  { %v1917_v60 = vmul.f32 0.0, %v1901_v51 }
 0x531   :  { %v1932_v18 = vadd.f32 %v1931_v25, %v1917_v60 }
 0x532   :  { %v1880_v17 = vpop.f32.mrf.mxu2 }
 0x533   :  { %v3914_v49 = vadd.f32 %v1880_v17, %v3854_v55 }
 0x535   :  { %v1902_v21 = vmax.f32 %v3914_v49, 0.0 }
 0x537   :  { %v1918_v20 = vmul.f32 0.0, %v1902_v21 }
 0x539   :  { %v1933_v27 = vadd.f32 %v1932_v18, %v1918_v20 }
 0x53a   :  { %v1882_v11 = vpop.f32.mrf.mxu2 }
 0x53b   :  { %v3918_v57 = vadd.f32 %v1882_v11, %v3854_v55 }
 0x53d   :  { %v1903_v41 = vmax.f32 %v3918_v57, 0.0 }
 0x53f   :  { %v1919_v14 = vmul.f32 0.0, %v1903_v41 }
 0x541   :  { %v1934_v46 = vadd.f32 %v1933_v27, %v1919_v14 }
 0x542   :  { %v1885_v30 = vpop.f32.mrf.mxu2 }
 0x543   :  { %v3922_v42 = vadd.f32 %v1885_v30, %v3854_v55 }
 0x545   :  { %v1904_v31 = vmax.f32 %v3922_v42, 0.0 }
 0x547   :  { %v1920_v3 = vmul.f32 0.0, %v1904_v31 }
 0x549   :  { %v1935_v56 = vadd.f32 %v1934_v46, %v1920_v3 }
 0x54a   :  { %v1887_v15 = vpop.f32.mrf.mxu2 }
 0x54b   :  { %v1888_v48 = vadd.f32 %v1887_v15, %v3854_v55 }
 0x54d   :  { %v1905_v16 = vmax.f32 %v1888_v48, 0.0 }
 0x54f   :  { %v1921_v40 = vmul.f32 0.0, %v1905_v16 }
 0x551   :  { %v1936_v12 = vadd.f32 %v1935_v56, %v1921_v40  ;;  %v2822_v40 = vld [vmem:[#allocation15 + $0x28] sm:$0xff] }
 0x552   :  { %2150 = vmatpush.bf16.msrb.mxu3 %v2822_v40 }
 0x553   :  { %v1937_v34 = vrot.slane %v1936_v12, 4 }
 0x555   :  { %v1938_v7 = vadd.f32 %v1937_v34, %v1936_v12 }
 0x557   :  { %v1939_v45 = vrot.slane %v1938_v7, 2 }
 0x559   :  { %v1940_v4 = vadd.f32 %v1939_v45, %v1938_v7 }
 0x55b   :  { %v1941_v17 = vrot.slane %v1940_v4, 1 }
 0x55d   :  { %v1942_v22 = vadd.f32 %v1941_v17, %v1940_v4 }
 0x55f   :  { %v1943_v10 = vmul.f32 0.0625, %v1942_v22 }
 0x561   :  { %v3929_v59 = vsub.f32 %v1890_v44, %v1943_v10  ;;  %v3933_v39 = vsub.f32 %v1891_v8, %v1943_v10  ;;  %v3937_v55 = vsub.f32 %v1892_v54, %v1943_v10  ;;  %v3941_v9 = vsub.f32 %v1893_v52, %v1943_v10 }
 0x562   :  { %v3945_v11 = vsub.f32 %v1894_v29, %v1943_v10  ;;  %v3952_v8 = vsub.f32 %v1895_v24, %v1943_v10  ;;  %v3955_v62 = vsub.f32 %v1896_v5, %v1943_v10  ;;  %v3958_v29 = vsub.f32 %v1897_v36, %v1943_v10 }
 0x563   :  { %v1962_v28 = vmul.f32 0.0, %v3937_v55  ;;  %v1976_v44 = vmul.f32 %v3929_v59, %v3929_v59  ;;  %v1977_v43 = vmul.f32 %v3933_v39, %v3933_v39  ;;  %v1963_v35 = vmul.f32 0.0, %v3941_v9 }
 0x564   :  { %v1964_v52 = vmul.f32 0.0, %v3945_v11  ;;  %v1965_v61 = vmul.f32 0.0, %v3952_v8  ;;  %v3961_v50 = vsub.f32 %v1898_v33, %v1943_v10  ;;  %v1966_v26 = vmul.f32 0.0, %v3955_v62 }
 0x565   :  { %v1978_v54 = vmul.f32 %v1962_v28, %v1962_v28  ;;  %v1992_v32 = vadd.f32 %v1977_v43, %v1976_v44  ;;  %v1979_v63 = vmul.f32 %v1963_v35, %v1963_v35  ;;  %v3964_v6 = vsub.f32 %v1899_v58, %v1943_v10  ;;  %v2819_v35 = vld [vmem:[#allocation15 + $0x10] sm:$0xff] }
 0x566   :  { %v1980_v24 = vmul.f32 %v1964_v52, %v1964_v52  ;;  %v1967_v5 = vmul.f32 0.0, %v3958_v29  ;;  %v1981_v49 = vmul.f32 %v1965_v61, %v1965_v61  ;;  %v3967_v37 = vsub.f32 %v1900_v13, %v1943_v10 }
 0x567   :  { %v1993_v23 = vadd.f32 %v1992_v32, %v1978_v54  ;;  %v1968_v36 = vmul.f32 0.0, %v3961_v50  ;;  %v1982_v57 = vmul.f32 %v1966_v26, %v1966_v26  ;;  %v3970_v38 = vsub.f32 %v1901_v51, %v1943_v10  ;;  %v2818_v32 = vld [vmem:[#allocation15 + $0x8] sm:$0xff] }
 0x568   :  { %v1969_v33 = vmul.f32 0.0, %v3964_v6  ;;  %v1983_v2 = vmul.f32 %v1967_v5, %v1967_v5  ;;  %v3973_v53 = vsub.f32 %v1902_v21, %v1943_v10  ;;  %v1970_v58 = vmul.f32 0.0, %v3967_v37 }
 0x569   :  { %v1994_v47 = vadd.f32 %v1993_v23, %v1979_v63  ;;  %v1984_v60 = vmul.f32 %v1968_v36, %v1968_v36  ;;  %v3976_v20 = vsub.f32 %v1903_v41, %v1943_v10  ;;  %v1971_v13 = vmul.f32 0.0, %v3970_v38  ;;  %v2817_v63 = vld [vmem:[#allocation15] sm:$0xff] }
 0x56a   :  { %v1985_v18 = vmul.f32 %v1969_v33, %v1969_v33  ;;  %v3979_v15 = vsub.f32 %v1904_v31, %v1943_v10  ;;  %v1972_v51 = vmul.f32 0.0, %v3973_v53  ;;  %v1986_v27 = vmul.f32 %v1970_v58, %v1970_v58  ;;  %v2821_v31 = vld [vmem:[#allocation15 + $0x20] sm:$0xff] }
 0x56b   :  { %v1995_v19 = vadd.f32 %v1994_v47, %v1980_v24  ;;  %v1959_v48 = vsub.f32 %v1905_v16, %v1943_v10  ;;  %v1973_v21 = vmul.f32 0.0, %v3976_v20  ;;  %v1987_v46 = vmul.f32 %v1971_v13, %v1971_v13  ;;  %2151 = vmatpush.bf16.msrb.mxu3 %v2821_v31  ;;  %v2820_v16 = vld [vmem:[#allocation15 + $0x18] sm:$0xff] }
 0x56c   :  { %v1974_v12 = vmul.f32 0.0, %v3979_v15  ;;  %v1988_v41 = vmul.f32 %v1972_v51, %v1972_v51  ;;  %v2041_v33 = vperm.slane %v3225_v0, 7 }
 0x56d   :  { %v1996_v30 = vadd.f32 %v1995_v19, %v1981_v49  ;;  %v1975_v7 = vmul.f32 0.0, %v1959_v48  ;;  %v1989_v45 = vmul.f32 %v1973_v21, %v1973_v21 }
 0x56e   :  { %v1990_v17 = vmul.f32 %v1974_v12, %v1974_v12 }
 0x56f   :  { %v1997_v42 = vadd.f32 %v1996_v30, %v1982_v57  ;;  %v1991_v28 = vmul.f32 %v1975_v7, %v1975_v7  ;;  %2152 = vmatpush.bf16.msrb.mxu3 %v2820_v16 }
 0x571   :  { %v1998_v25 = vadd.f32 %v1997_v42, %v1983_v2 }
 0x573   :  { %v1999_v14 = vadd.f32 %v1998_v25, %v1984_v60  ;;  %2153 = vmatpush.bf16.msrb.mxu3 %v2819_v35  ;;  %v2058_v25 = vperm.slane %v3227_v1, 0 }
 0x575   :  { %v2000_v3 = vadd.f32 %v1999_v14, %v1985_v18 }
 0x577   :  { %v2001_v56 = vadd.f32 %v2000_v3, %v1986_v27  ;;  %2154 = vmatpush.bf16.msrb.mxu3 %v2818_v32 }
 0x579   :  { %v2002_v34 = vadd.f32 %v2001_v56, %v1987_v46 }
 0x57b   :  { %v2003_v4 = vadd.f32 %v2002_v34, %v1988_v41  ;;  %2155 = vmatpush.bf16.msrb.mxu3 %v2817_v63 }
 0x57d   :  { %v2004_v22 = vadd.f32 %v2003_v4, %v1989_v45 }
 0x57f   :  { %v2005_v44 = vadd.f32 %v2004_v22, %v1990_v17 }
 0x581   :  { %v2006_v10 = vadd.f32 %v2005_v44, %v1991_v28 }
 0x583   :  { %v2007_v43 = vrot.slane %v2006_v10, 4 }
 0x585   :  { %v2008_v54 = vadd.f32 %v2007_v43, %v2006_v10 }
 0x587   :  { %v2009_v52 = vrot.slane %v2008_v54, 2 }
 0x589   :  { %v2010_v61 = vadd.f32 %v2009_v52, %v2008_v54 }
 0x58b   :  { %v2011_v23 = vrot.slane %v2010_v61, 1 }
 0x58d   :  { %v2012_v26 = vadd.f32 %v2011_v23, %v2010_v61 }
 0x58f   :  { %v2013_v24 = vmul.f32 0.0625, %v2012_v26 }
 0x591   :  { %v2014_v47 = vadd.f32 1e-05, %v2013_v24 }
 0x593   :  { %2845 = vrsqrt.f32 %v2014_v47  ;;  %vm2021_vm7 = vweird.f32 %v2014_v47 }
 0x599   :  { %v2846_v5 = vpop.eup %2845 }
 0x59a   :  { %v2016_v49 = vmul.f32 %v2846_v5, %v2014_v47  ;;  %vm2022_vm6 = vweird.f32 %v2846_v5 }
 0x59b   :  { %vm2023_vm8 = vmor %vm2021_vm7, %vm2022_vm6 }
 0x59c   :  { %v2017_v19 = vmul.f32 %v2846_v5, %v2016_v49 }
 0x59e   :  { %v2018_v36 = vmul.f32 0.5, %v2017_v19 }
 0x5a0   :  { %v2019_v57 = vsub.f32 1.5, %v2018_v36 }
 0x5a2   :  { %v2020_v30 = vmul.f32 %v2846_v5, %v2019_v57 }
 0x5a4   :  { %v2024_v2 = vsel %vm2023_vm8, %v2846_v5, %v2020_v30 }
 0x5a5   :  { %v2040_v42 = vmul.f32 %v2024_v2, %v1959_v48  ;;  %v2025_v58 = vmul.f32 %v2024_v2, %v3929_v59  ;;  %v2026_v60 = vmul.f32 %v2024_v2, %v3933_v39  ;;  %v2033_v21 = vmul.f32 %v2024_v2, %v3961_v50 }
 0x5a6   :  { %v2034_v46 = vmul.f32 %v2024_v2, %v3964_v6  ;;  %v2027_v0 = vmul.f32 %v2024_v2, %v3937_v55  ;;  %v2035_v48 = vmul.f32 %v2024_v2, %v3967_v37  ;;  %v2036_v39 = vmul.f32 %v2024_v2, %v3970_v38 }
 0x5a7   :  { %v2057_v13 = vmul.f32 %v2041_v33, %v2040_v42  ;;  %v2042_v18 = vmul.f32 %v2041_v33, %v2025_v58  ;;  %v2043_v14 = vmul.f32 %v2041_v33, %v2026_v60  ;;  %v2050_v59 = vmul.f32 %v2041_v33, %v2033_v21 }
 0x5a8   :  { %v2051_v56 = vmul.f32 %v2041_v33, %v2034_v46  ;;  %v2037_v40 = vmul.f32 %v2024_v2, %v3973_v53  ;;  %v2028_v12 = vmul.f32 %v2024_v2, %v3941_v9  ;;  %v2052_v41 = vmul.f32 %v2041_v33, %v2035_v48 }
 0x5a9   :  { %v2059_v51 = vadd.f32 %v2058_v25, %v2042_v18  ;;  %v2060_v27 = vadd.f32 %v2058_v25, %v2043_v14  ;;  %v2038_v34 = vmul.f32 %v2024_v2, %v3976_v20  ;;  %v2039_v50 = vmul.f32 %v2024_v2, %v3979_v15 }
 0x5aa   :  { %v2067_v7 = vadd.f32 %v2058_v25, %v2050_v59  ;;  %v2068_v6 = vadd.f32 %v2058_v25, %v2051_v56  ;;  %v2053_v45 = vmul.f32 %v2041_v33, %v2036_v39  ;;  %v2054_v55 = vmul.f32 %v2041_v33, %v2037_v40 }
 0x5ab   :  { %v2075_v3 = vpack.c.bf16 %v2060_v27, %v2059_v51  ;;  %v2069_v4 = vadd.f32 %v2058_v25, %v2052_v41  ;;  %v2055_v37 = vmul.f32 %v2041_v33, %v2038_v34  ;;  %v2056_v31 = vmul.f32 %v2041_v33, %v2039_v50 }
 0x5ac   :  { %v2074_v17 = vadd.f32 %v2058_v25, %v2057_v13  ;;  %v2079_v22 = vpack.c.bf16 %v2068_v6, %v2067_v7  ;;  %v2070_v28 = vadd.f32 %v2058_v25, %v2053_v45  ;;  %v2071_v38 = vadd.f32 %v2058_v25, %v2054_v55 }
 0x5ad   :  { %2156 = vmatmul.bf16.vlgmr.msrb.gmra.mxu3 %v2075_v3  ;;  %v2072_v44 = vadd.f32 %v2058_v25, %v2055_v37  ;;  %v2073_v53 = vadd.f32 %v2058_v25, %v2056_v31  ;;  %v2044_v16 = vmul.f32 %v2041_v33, %v2027_v0  ;;  %v2045_v9 = vmul.f32 %v2041_v33, %v2028_v12 }
 0x5ae   :  { %v2080_v10 = vpack.c.bf16 %v2070_v28, %v2069_v4  ;;  %v2029_v52 = vmul.f32 %v2024_v2, %v3945_v11  ;;  %v2030_v32 = vmul.f32 %v2024_v2, %v3952_v8  ;;  %v2031_v47 = vmul.f32 %v2024_v2, %v3955_v62 }
 0x5af   :  { %v2081_v43 = vpack.c.bf16 %v2072_v44, %v2071_v38  ;;  %v2082_v20 = vpack.c.bf16 %v2074_v17, %v2073_v53  ;;  %v2061_v35 = vadd.f32 %v2058_v25, %v2044_v16  ;;  %v2062_v15 = vadd.f32 %v2058_v25, %v2045_v9 }
 0x5b0   :  { %v2046_v61 = vmul.f32 %v2041_v33, %v2029_v52  ;;  %v2047_v63 = vmul.f32 %v2041_v33, %v2030_v32  ;;  %v2032_v5 = vmul.f32 %v2024_v2, %v3958_v29  ;;  %v2048_v49 = vmul.f32 %v2041_v33, %v2031_v47 }
 0x5b1   :  { %v2076_v54 = vpack.c.bf16 %v2062_v15, %v2061_v35  ;;  %v2197_v11 = vlaneseq  ;;  %v4004_v42 = vperm.slane %v3227_v1, 1 }
 0x5b2   :  { %v2063_v23 = vadd.f32 %v2058_v25, %v2046_v61  ;;  %v2064_v26 = vadd.f32 %v2058_v25, %v2047_v63  ;;  %v2049_v19 = vmul.f32 %v2041_v33, %v2032_v5  ;;  %v2065_v36 = vadd.f32 %v2058_v25, %v2048_v49 }
 0x5b3   :  { %v4001_v8 = vand.u32 127, %v2197_v11 }
 0x5b4   :  { %v2077_v24 = vpack.c.bf16 %v2064_v26, %v2063_v23  ;;  %v2066_v57 = vadd.f32 %v2058_v25, %v2049_v19 }
 0x5b5   :  { %vm2199_vm9 = vcmp.lt.s32.totalorder %v4001_v8, 8 }
 0x5b6   :  { %v2078_v30 = vpack.c.bf16 %v2066_v57, %v2065_v36 }
 0x5bd   :  { %2161 = vmatmul.bf16.gmra.mxu3 %v2076_v54 }
 0x5cd   :  { %2166 = vmatmul.bf16.gmra.mxu3 %v2077_v24 }
 0x5dd   :  { %2171 = vmatmul.bf16.gmra.mxu3 %v2078_v30 }
 0x5ed   :  { %2176 = vmatmul.bf16.gmra.mxu3 %v2079_v22 }
 0x5fd   :  { %2181 = vmatmul.bf16.gmra.mxu3 %v2080_v10 }
 0x60d   :  { %2186 = vmatmul.bf16.gmra.mxu3 %v2081_v43 }
 0x61d   :  { %2191 = vmatmul.bf16.gmra.mxu3 %v2082_v20 }
 0x630   :  { %v2157_v58 = vpop.f32.mrf.mxu3 }
 0x631   :  { %v2158_v62 = vadd.f32 %v2157_v58, %v4004_v42 }
 0x633   :  { %v2200_v29 = vsel %vm2199_vm9, %v2158_v62, -1e+30 }
 0x634   :  { %2216 = vmax.xlane.f32.xlu2 %v2200_v29 }
 0x638   :  { %v2159_v33 = vpop.f32.mrf.mxu3 }
 0x639   :  { %v2160_v2 = vadd.f32 %v2159_v33, %v4004_v42 }
 0x63b   :  { %v4013_v60 = vsel %vm2199_vm9, %v2160_v2, -1e+30 }
 0x63c   :  { %2218 = vmax.xlane.f32.xlu0 %v4013_v60 }
 0x640   :  { %v2162_v1 = vpop.f32.mrf.mxu3 }
 0x641   :  { %v2163_v25 = vadd.f32 %v2162_v1, %v4004_v42 }
 0x643   :  { %v4019_v13 = vsel %vm2199_vm9, %v2163_v25, -1e+30 }
 0x644   :  { %2220 = vmax.xlane.f32.xlu1 %v4019_v13 }
 0x648   :  { %v2164_v18 = vpop.f32.mrf.mxu3 }
 0x649   :  { %v2165_v14 = vadd.f32 %v2164_v18, %v4004_v42 }
 0x64b   :  { %v4025_v51 = vsel %vm2199_vm9, %v2165_v14, -1e+30 }
 0x64c   :  { %2222 = vmax.xlane.f32.xlu2 %v4025_v51 }
 0x650   :  { %v2167_v27 = vpop.f32.mrf.mxu3 }
 0x651   :  { %v2168_v3 = vadd.f32 %v2167_v27, %v4004_v42 }
 0x653   :  { %v4031_v21 = vsel %vm2199_vm9, %v2168_v3, -1e+30 }
 0x654   :  { %2224 = vmax.xlane.f32.xlu2 %v4031_v21 }
 0x658   :  { %v2169_v46 = vpop.f32.mrf.mxu3 }
 0x659   :  { %v2170_v0 = vadd.f32 %v2169_v46, %v4004_v42 }
 0x65b   :  { %v4037_v48 = vsel %vm2199_vm9, %v2170_v0, -1e+30 }
 0x65c   :  { %2226 = vmax.xlane.f32.xlu0 %v4037_v48 }
 0x660   :  { %v2172_v59 = vpop.f32.mrf.mxu3 }
 0x661   :  { %v2173_v56 = vadd.f32 %v2172_v59, %v4004_v42 }
 0x663   :  { %v4043_v39 = vsel %vm2199_vm9, %v2173_v56, -1e+30 }
 0x664   :  { %2228 = vmax.xlane.f32.xlu1 %v4043_v39 }
 0x668   :  { %v2174_v40 = vpop.f32.mrf.mxu3 }
 0x669   :  { %v2175_v12 = vadd.f32 %v2174_v40, %v4004_v42 }
 0x66b   :  { %v4049_v41 = vsel %vm2199_vm9, %v2175_v12, -1e+30 }
 0x66c   :  { %2230 = vmax.xlane.f32.xlu2 %v4049_v41 }
 0x670   :  { %v2177_v34 = vpop.f32.mrf.mxu3 }
 0x671   :  { %v2178_v50 = vadd.f32 %v2177_v34, %v4004_v42 }
 0x673   :  { %v4055_v7 = vsel %vm2199_vm9, %v2178_v50, -1e+30 }
 0x674   :  { %2232 = vmax.xlane.f32.xlu0 %v4055_v7 }
 0x678   :  { %v2179_v6 = vpop.f32.mrf.mxu3 }
 0x679   :  { %v2180_v45 = vadd.f32 %v2179_v6, %v4004_v42 }
 0x67b   :  { %v4061_v55 = vsel %vm2199_vm9, %v2180_v45, -1e+30 }
 0x67c   :  { %2234 = vmax.xlane.f32.xlu1 %v4061_v55 }
 0x680   :  { %v2182_v4 = vpop.f32.mrf.mxu3 }
 0x681   :  { %v2183_v37 = vadd.f32 %v2182_v4, %v4004_v42 }
 0x683   :  { %v4067_v31 = vsel %vm2199_vm9, %v2183_v37, -1e+30 }
 0x684   :  { %2236 = vmax.xlane.f32.xlu2 %v4067_v31 }
 0x688   :  { %v2184_v17 = vpop.f32.mrf.mxu3 }
 0x689   :  { %v2185_v22 = vadd.f32 %v2184_v17, %v4004_v42 }
 0x68b   :  { %v4073_v28 = vsel %vm2199_vm9, %v2185_v22, -1e+30 }
 0x68c   :  { %2238 = vmax.xlane.f32.xlu0 %v4073_v28 }
 0x690   :  { %v2187_v38 = vpop.f32.mrf.mxu3 }
 0x691   :  { %v2188_v44 = vadd.f32 %v2187_v38, %v4004_v42 }
 0x693   :  { %v4079_v53 = vsel %vm2199_vm9, %v2188_v44, -1e+30 }
 0x694   :  { %2240 = vmax.xlane.f32.xlu1 %v4079_v53 }
 0x698   :  { %v2189_v16 = vpop.f32.mrf.mxu3 }
 0x699   :  { %v2190_v9 = vadd.f32 %v2189_v16, %v4004_v42 }
 0x69b   :  { %v4085_v10 = vsel %vm2199_vm9, %v2190_v9, -1e+30 }
 0x69c   :  { %2242 = vmax.xlane.f32.xlu2 %v4085_v10 }
 0x6a0   :  { %v2192_v43 = vpop.f32.mrf.mxu3 }
 0x6a1   :  { %v2193_v20 = vadd.f32 %v2192_v43, %v4004_v42 }
 0x6a3   :  { %v4091_v35 = vsel %vm2199_vm9, %v2193_v20, -1e+30 }
 0x6a4   :  { %2244 = vmax.xlane.f32.xlu0 %v4091_v35 }
 0x6a7   :  { %v2217_v15 = vpop.xlane.xlu2 %2216 }
 0x6a8   :  { %v4094_v54 = vsub.f32 %v2200_v29, %v2217_v15  ;;  %v2194_v52 = vpop.f32.mrf.mxu3 }
 0x6a9   :  { %v2195_v32 = vadd.f32 %v2194_v52, %v4004_v42 }
 0x6aa   :  { %v2264_v61 = vmul.f32 1.442695, %v4094_v54 }
 0x6ab   :  { %v4100_v63 = vsel %vm2199_vm9, %v2195_v32, -1e+30 }
 0x6ac   :  { %2847 = vpow2.f32 %v2264_v61  ;;  %2246 = vmax.xlane.f32.xlu1 %v4100_v63 }
 0x6af   :  { %v2219_v23 = vpop.xlane.xlu0 %2218 }
 0x6b0   :  { %v4104_v26 = vsub.f32 %v4013_v60, %v2219_v23 }
 0x6b2   :  { %v2848_v24 = vpop.eup %2847  ;;  %v2266_v47 = vmul.f32 1.442695, %v4104_v26 }
 0x6b3   :  { %2296 = vadd.xlane.f32.xlu2 %v2848_v24 }
 0x6b4   :  { %2849 = vpow2.f32 %v2266_v47 }
 0x6b7   :  { %v2221_v5 = vpop.xlane.xlu1 %2220 }
 0x6b8   :  { %v4108_v49 = vsub.f32 %v4019_v13, %v2221_v5 }
 0x6ba   :  { %v2850_v19 = vpop.eup %2849  ;;  %v2268_v36 = vmul.f32 1.442695, %v4108_v49 }
 0x6bb   :  { %2298 = vadd.xlane.f32.xlu0 %v2850_v19 }
 0x6bc   :  { %2851 = vpow2.f32 %v2268_v36 }
 0x6bf   :  { %v2223_v57 = vpop.xlane.xlu2 %2222 }
 0x6c0   :  { %v4112_v30 = vsub.f32 %v4025_v51, %v2223_v57 }
 0x6c2   :  { %v2852_v11 = vpop.eup %2851  ;;  %v2270_v8 = vmul.f32 1.442695, %v4112_v30 }
 0x6c3   :  { %2300 = vadd.xlane.f32.xlu1 %v2852_v11 }
 0x6c4   :  { %2853 = vpow2.f32 %v2270_v8 }
 0x6c7   :  { %v2225_v42 = vpop.xlane.xlu2 %2224 }
 0x6c8   :  { %v4116_v58 = vsub.f32 %v4031_v21, %v2225_v42 }
 0x6ca   :  { %v2854_v62 = vpop.eup %2853  ;;  %v2272_v29 = vmul.f32 1.442695, %v4116_v58 }
 0x6cb   :  { %2302 = vadd.xlane.f32.xlu2 %v2854_v62 }
 0x6cc   :  { %2855 = vpow2.f32 %v2272_v29 }
 0x6cf   :  { %v2227_v33 = vpop.xlane.xlu0 %2226 }
 0x6d0   :  { %v4120_v2 = vsub.f32 %v4037_v48, %v2227_v33 }
 0x6d2   :  { %v2856_v60 = vpop.eup %2855  ;;  %v2274_v1 = vmul.f32 1.442695, %v4120_v2 }
 0x6d3   :  { %2304 = vadd.xlane.f32.xlu0 %v2856_v60 }
 0x6d4   :  { %2857 = vpow2.f32 %v2274_v1 }
 0x6d7   :  { %v2229_v25 = vpop.xlane.xlu1 %2228 }
 0x6d8   :  { %v4124_v13 = vsub.f32 %v4043_v39, %v2229_v25 }
 0x6da   :  { %v2858_v18 = vpop.eup %2857  ;;  %v2276_v14 = vmul.f32 1.442695, %v4124_v13 }
 0x6db   :  { %2306 = vadd.xlane.f32.xlu1 %v2858_v18 }
 0x6dc   :  { %2859 = vpow2.f32 %v2276_v14 }
 0x6df   :  { %v2231_v51 = vpop.xlane.xlu2 %2230 }
 0x6e0   :  { %v4128_v27 = vsub.f32 %v4049_v41, %v2231_v51 }
 0x6e2   :  { %v2860_v3 = vpop.eup %2859  ;;  %v2278_v21 = vmul.f32 1.442695, %v4128_v27 }
 0x6e3   :  { %2308 = vadd.xlane.f32.xlu2 %v2860_v3 }
 0x6e4   :  { %2861 = vpow2.f32 %v2278_v21 }
 0x6e7   :  { %v2233_v46 = vpop.xlane.xlu0 %2232 }
 0x6e8   :  { %v4132_v0 = vsub.f32 %v4055_v7, %v2233_v46 }
 0x6ea   :  { %v2862_v48 = vpop.eup %2861  ;;  %v2280_v59 = vmul.f32 1.442695, %v4132_v0 }
 0x6eb   :  { %2310 = vadd.xlane.f32.xlu0 %v2862_v48 }
 0x6ec   :  { %2863 = vpow2.f32 %v2280_v59 }
 0x6ef   :  { %v2235_v56 = vpop.xlane.xlu1 %2234 }
 0x6f0   :  { %v4136_v39 = vsub.f32 %v4061_v55, %v2235_v56 }
 0x6f2   :  { %v2864_v40 = vpop.eup %2863  ;;  %v2282_v12 = vmul.f32 1.442695, %v4136_v39 }
 0x6f3   :  { %2312 = vadd.xlane.f32.xlu1 %v2864_v40 }
 0x6f4   :  { %2865 = vpow2.f32 %v2282_v12 }
 0x6f7   :  { %v2237_v41 = vpop.xlane.xlu2 %2236 }
 0x6f8   :  { %v4140_v34 = vsub.f32 %v4067_v31, %v2237_v41 }
 0x6fa   :  { %v2866_v50 = vpop.eup %2865  ;;  %v2284_v7 = vmul.f32 1.442695, %v4140_v34 }
 0x6fb   :  { %2314 = vadd.xlane.f32.xlu2 %v2866_v50 }
 0x6fc   :  { %2867 = vpow2.f32 %v2284_v7 }
 0x6ff   :  { %v2239_v6 = vpop.xlane.xlu0 %2238 }
 0x700   :  { %v4144_v45 = vsub.f32 %v4073_v28, %v2239_v6 }
 0x702   :  { %v2868_v55 = vpop.eup %2867  ;;  %v2286_v4 = vmul.f32 1.442695, %v4144_v45 }
 0x703   :  { %2316 = vadd.xlane.f32.xlu0 %v2868_v55 }
 0x704   :  { %2869 = vpow2.f32 %v2286_v4 }
 0x707   :  { %v2241_v37 = vpop.xlane.xlu1 %2240 }
 0x708   :  { %v4148_v17 = vsub.f32 %v4079_v53, %v2241_v37 }
 0x70a   :  { %v2870_v31 = vpop.eup %2869  ;;  %v2288_v22 = vmul.f32 1.442695, %v4148_v17 }
 0x70b   :  { %2318 = vadd.xlane.f32.xlu1 %v2870_v31 }
 0x70c   :  { %2871 = vpow2.f32 %v2288_v22 }
 0x70f   :  { %v2243_v38 = vpop.xlane.xlu2 %2242 }
 0x710   :  { %v4152_v44 = vsub.f32 %v4085_v10, %v2243_v38 }
 0x712   :  { %v2872_v28 = vpop.eup %2871  ;;  %v2290_v16 = vmul.f32 1.442695, %v4152_v44 }
 0x713   :  { %2320 = vadd.xlane.f32.xlu2 %v2872_v28 }
 0x714   :  { %2873 = vpow2.f32 %v2290_v16 }
 0x717   :  { %v2245_v9 = vpop.xlane.xlu0 %2244 }
 0x718   :  { %v4156_v43 = vsub.f32 %v4091_v35, %v2245_v9 }
 0x71a   :  { %v2874_v53 = vpop.eup %2873  ;;  %v2292_v20 = vmul.f32 1.442695, %v4156_v43 }
 0x71b   :  { %2322 = vadd.xlane.f32.xlu0 %v2874_v53 }
 0x71c   :  { %2875 = vpow2.f32 %v2292_v20 }
 0x71f   :  { %v2247_v15 = vpop.xlane.xlu1 %2246 }
 0x720   :  { %v4160_v52 = vsub.f32 %v4100_v63, %v2247_v15 }
 0x722   :  { %v2876_v10 = vpop.eup %2875  ;;  %v2294_v32 = vmul.f32 1.442695, %v4160_v52 }
 0x723   :  { %2324 = vadd.xlane.f32.xlu1 %v2876_v10 }
 0x724   :  { %2877 = vpow2.f32 %v2294_v32 }
 0x726   :  { %v2297_v61 = vpop.xlane.xlu2 %2296 }
 0x727   :  { %2879 = vlog2.f32 %v2297_v61 }
 0x72a   :  { %v2878_v23 = vpop.eup %2877 }
 0x72b   :  { %2326 = vadd.xlane.f32.xlu2 %v2878_v23 }
 0x72d   :  { %v2880_v35 = vpop.eup %2879 }
 0x72e   :  { %v2329_v24 = vmul.f32 0.6931472, %v2880_v35  ;;  %v2299_v47 = vpop.xlane.xlu0 %2298 }
 0x72f   :  { %2881 = vlog2.f32 %v2299_v47 }
 0x730   :  { %v2360_v5 = vsub.f32 %v4094_v54, %v2329_v24 }
 0x732   :  { %2376 = vst [vmem:[#allocation18] sm:$0xff] %v2360_v5 }
 0x735   :  { %v2882_v19 = vpop.eup %2881 }
 0x736   :  { %v2331_v36 = vmul.f32 0.6931472, %v2882_v19  ;;  %v2301_v63 = vpop.xlane.xlu1 %2300 }
 0x737   :  { %2883 = vlog2.f32 %v2301_v63 }
 0x738   :  { %v2361_v57 = vsub.f32 %v4104_v26, %v2331_v36 }
 0x73a   :  { %2377 = vst [vmem:[#allocation18 + $0x8] sm:$0xff] %v2361_v57 }
 0x73d   :  { %v2884_v11 = vpop.eup %2883 }
 0x73e   :  { %v2333_v8 = vmul.f32 0.6931472, %v2884_v11  ;;  %v2303_v42 = vpop.xlane.xlu2 %2302 }
 0x73f   :  { %2885 = vlog2.f32 %v2303_v42 }
 0x740   :  { %v2362_v62 = vsub.f32 %v4108_v49, %v2333_v8 }
 0x742   :  { %2378 = vst [vmem:[#allocation18 + $0x10] sm:$0xff] %v2362_v62 }
 0x745   :  { %v2886_v29 = vpop.eup %2885 }
 0x746   :  { %v2335_v33 = vmul.f32 0.6931472, %v2886_v29  ;;  %v2305_v60 = vpop.xlane.xlu0 %2304 }
 0x747   :  { %2887 = vlog2.f32 %v2305_v60 }
 0x748   :  { %v2363_v54 = vsub.f32 %v4112_v30, %v2335_v33 }
 0x74a   :  { %2379 = vst [vmem:[#allocation18 + $0x18] sm:$0xff] %v2363_v54 }
 0x74d   :  { %v2888_v1 = vpop.eup %2887 }
 0x74e   :  { %v2337_v25 = vmul.f32 0.6931472, %v2888_v1  ;;  %v2307_v18 = vpop.xlane.xlu1 %2306 }
 0x74f   :  { %2889 = vlog2.f32 %v2307_v18 }
 0x750   :  { %v2364_v26 = vsub.f32 %v4116_v58, %v2337_v25 }
 0x752   :  { %2380 = vst [vmem:[#allocation18 + $0x20] sm:$0xff] %v2364_v26 }
 0x755   :  { %v2890_v14 = vpop.eup %2889 }
 0x756   :  { %v2339_v51 = vmul.f32 0.6931472, %v2890_v14  ;;  %v2309_v3 = vpop.xlane.xlu2 %2308 }
 0x757   :  { %2891 = vlog2.f32 %v2309_v3 }
 0x758   :  { %v2365_v49 = vsub.f32 %v4120_v2, %v2339_v51 }
 0x75a   :  { %2381 = vst [vmem:[#allocation18 + $0x28] sm:$0xff] %v2365_v49 }
 0x75d   :  { %v2892_v21 = vpop.eup %2891 }
 0x75e   :  { %v2341_v46 = vmul.f32 0.6931472, %v2892_v21  ;;  %v2311_v48 = vpop.xlane.xlu0 %2310 }
 0x75f   :  { %2893 = vlog2.f32 %v2311_v48 }
 0x760   :  { %v2366_v30 = vsub.f32 %v4124_v13, %v2341_v46 }
 0x762   :  { %2382 = vst [vmem:[#allocation18 + $0x30] sm:$0xff] %v2366_v30 }
 0x765   :  { %v2894_v59 = vpop.eup %2893 }
 0x766   :  { %v2343_v56 = vmul.f32 0.6931472, %v2894_v59  ;;  %v2313_v40 = vpop.xlane.xlu1 %2312 }
 0x767   :  { %2895 = vlog2.f32 %v2313_v40 }
 0x768   :  { %v2367_v58 = vsub.f32 %v4128_v27, %v2343_v56 }
 0x76a   :  { %2383 = vst [vmem:[#allocation18 + $0x38] sm:$0xff] %v2367_v58 }
 0x76d   :  { %v2896_v12 = vpop.eup %2895 }
 0x76e   :  { %v2345_v41 = vmul.f32 0.6931472, %v2896_v12  ;;  %v2315_v50 = vpop.xlane.xlu2 %2314 }
 0x76f   :  { %2897 = vlog2.f32 %v2315_v50 }
 0x770   :  { %v2368_v2 = vsub.f32 %v4132_v0, %v2345_v41 }
 0x772   :  { %2384 = vst [vmem:[#allocation18 + $0x40] sm:$0xff] %v2368_v2 }
 0x775   :  { %v2898_v7 = vpop.eup %2897 }
 0x776   :  { %v2347_v6 = vmul.f32 0.6931472, %v2898_v7  ;;  %v2317_v55 = vpop.xlane.xlu0 %2316 }
 0x777   :  { %2899 = vlog2.f32 %v2317_v55 }
 0x778   :  { %v2369_v13 = vsub.f32 %v4136_v39, %v2347_v6 }
 0x77a   :  { %2385 = vst [vmem:[#allocation18 + $0x48] sm:$0xff] %v2369_v13 }
 0x77d   :  { %v2900_v4 = vpop.eup %2899 }
 0x77e   :  { %v2349_v37 = vmul.f32 0.6931472, %v2900_v4  ;;  %v2319_v31 = vpop.xlane.xlu1 %2318 }
 0x77f   :  { %2901 = vlog2.f32 %v2319_v31 }
 0x780   :  { %v2370_v27 = vsub.f32 %v4140_v34, %v2349_v37 }
 0x782   :  { %2386 = vst [vmem:[#allocation18 + $0x50] sm:$0xff] %v2370_v27 }
 0x785   :  { %v2902_v22 = vpop.eup %2901 }
 0x786   :  { %v2351_v38 = vmul.f32 0.6931472, %v2902_v22  ;;  %v2321_v28 = vpop.xlane.xlu2 %2320 }
 0x787   :  { %2903 = vlog2.f32 %v2321_v28 }
 0x788   :  { %v2371_v0 = vsub.f32 %v4144_v45, %v2351_v38 }
 0x78a   :  { %2387 = vst [vmem:[#allocation18 + $0x58] sm:$0xff] %v2371_v0 }
 0x78d   :  { %v2904_v16 = vpop.eup %2903 }
 0x78e   :  { %v2353_v9 = vmul.f32 0.6931472, %v2904_v16  ;;  %v2323_v53 = vpop.xlane.xlu0 %2322 }
 0x78f   :  { %2905 = vlog2.f32 %v2323_v53 }
 0x790   :  { %v2372_v39 = vsub.f32 %v4148_v17, %v2353_v9 }
 0x792   :  { %2388 = vst [vmem:[#allocation18 + $0x60] sm:$0xff] %v2372_v39 }
 0x795   :  { %v2906_v20 = vpop.eup %2905 }
 0x796   :  { %v2355_v15 = vmul.f32 0.6931472, %v2906_v20  ;;  %v2325_v10 = vpop.xlane.xlu1 %2324 }
 0x797   :  { %2907 = vlog2.f32 %v2325_v10 }
 0x798   :  { %v2373_v34 = vsub.f32 %v4152_v44, %v2355_v15 }
 0x79a   :  { %2389 = vst [vmem:[#allocation18 + $0x68] sm:$0xff] %v2373_v34 }
 0x79d   :  { %v2908_v32 = vpop.eup %2907 }
 0x79e   :  { %v2357_v61 = vmul.f32 0.6931472, %v2908_v32  ;;  %v2327_v23 = vpop.xlane.xlu2 %2326 }
 0x79f   :  { %2909 = vlog2.f32 %v2327_v23 }
 0x7a0   :  { %v2374_v45 = vsub.f32 %v4156_v43, %v2357_v61 }
 0x7a2   :  { %2390 = vst [vmem:[#allocation18 + $0x70] sm:$0xff] %v2374_v45 }
 0x7a5   :  { %v2910_v35 = vpop.eup %2909 }
 0x7a6   :  { %v2359_v17 = vmul.f32 0.6931472, %v2910_v35 }
 0x7a8   :  { %v2375_v24 = vsub.f32 %v4160_v52, %v2359_v17 }
 0x7aa   :  { %2391 = vst [vmem:[#allocation18 + $0x78] sm:$0xff] %v2375_v24 }
 0x7ab   :  { %2404 = dma.vmem_to_hbm [thread:$0]  %s2397_s18, 2048, %s2399_s20, [#allocation8], %s3124_s26, %s3124_s26, %s3125_s4  }
 0x7ac   :  { %3113 = dma.done.wait [#allocation8], 2048  }
 0x7ad   :  { %3114 = vsyncadd [#allocation8], 4294965248 }
 0x7ae   :  { %2409 = vsyncpa [#allocation7], 1 }
 0x7af   :  { %2410 = vsyncpa [#allocation10], 1 }
 0x7b0   :  { %2411 = vsyncpa [#allocation13], 1 }
 0x7b1   :  { %2412 = vsyncpa [#allocation16], 1 }
 0x7b2   :  { %2413 = vsyncpa [#allocation8], 1 }
 0x7b3   :  { %2414 = vsyncmov [#allocation5] }
 0x7b6   :  { %s2415_s23 = vpop.sfrf %2414 }
 0x7b7   :  { %p2744_p0 = scmp.ne.s32.totalorder %s2415_s23, 0 }
 0x7b9   :  { %2419 = shalt.err (%p2744_p0)  }

</bundles_post_ra>
